<compile_context>
chip_gen: v7x
topology: tpu7x:2x2x1
jax: 0.10.0
libtpu: 0.0.40
codegen_flags: <defaults>
</compile_context>

<pallas_src>
import jax
import jax.numpy as jnp
from jax.experimental import pallas as pl
from jax.experimental.pallas import tpu as pltpu

# ----------------------------- model config ---------------------------------
D_MODEL = 32
N_HEADS = 4
D_HEAD = D_MODEL // N_HEADS
N_LAYERS = 2
DFF = 64
VOCAB = 16
SEQ = 8
BATCH = 2
BS = BATCH * SEQ
LN_EPS = 1e-5
ATTN_SCALE = 1.0 / (D_HEAD ** 0.5)

# ----------------------------- slab layouts ----------------------------------
SLAB_LANES = 128            # lane-padded width of both slabs

# matrices slab (W_ROWS, 128): emb | per-layer [wqkv|wo|w1|w2] | out_w
EMB_R0 = 0                                   # (VOCAB, D_MODEL)
LAYER_W_R0 = EMB_R0 + VOCAB                  # 16
WQKV_OFF = 0                                 # (D_MODEL, 3*D_MODEL)  q-part pre-scaled
WO_OFF = WQKV_OFF + D_MODEL                  # 32  (D_MODEL, D_MODEL)
W1_OFF = WO_OFF + D_MODEL                    # 64  (D_MODEL, DFF)
W2_OFF = W1_OFF + D_MODEL                    # 96  (DFF, D_MODEL)
L_W_STRIDE = W2_OFF + DFF                    # 160 rows per layer
OUT_W_R0 = LAYER_W_R0 + N_LAYERS * L_W_STRIDE  # 336  (D_MODEL, VOCAB)
W_ROWS = OUT_W_R0 + D_MODEL                  # 368  (all offsets 8-aligned)

# vectors slab (V_ROWS, 128): per-layer 8-row block, then out_b
# per-layer rows: 0 bqkv(96, q-part pre-scaled) | 1 bo | 2 b1 | 3 b2
#                 | 4 ln1_g | 5 ln1_b | 6 ln2_g | 7 ln2_b
L_V_STRIDE = 8
OUT_B_R0 = N_LAYERS * L_V_STRIDE             # 16
V_ROWS = OUT_B_R0 + 8                        # 24


# ----------------------------- kernel helpers -------------------------------
def _layer_norm(x, gamma, beta, eps=LN_EPS):
    # x: (B*S, D), gamma/beta: (1, D) — torch.nn.LayerNorm over the last dim.
    mean = jnp.mean(x, axis=-1, keepdims=True)
    var = jnp.mean((x - mean) ** 2, axis=-1, keepdims=True)
    return (x - mean) * jax.lax.rsqrt(var + eps) * gamma + beta


def _softmax_last(s):
    # Divide goes to the EUP via approx reciprocal (otherwise-idle slot).
    s = s - jnp.max(s, axis=-1, keepdims=True)
    p = jnp.exp(s)
    return p * pl.reciprocal(jnp.sum(p, axis=-1, keepdims=True), approx=True)


# ----------------------------- fused forward kernel -------------------------
def fused_forward_kernel(tok_ref, w_ref, v_ref, out_ref):
    """tok_ref: SMEM (BS,) int32; w_ref/v_ref: VMEM weight slabs; out: (BS, V)."""
    f32 = jnp.float32

    # Embedding lookup: build a one-hot (BS, V) from SMEM scalars, then ONE MXU
    # matmul with the emb rows of the weight slab.
    iota_v = jax.lax.broadcasted_iota(jnp.int32, (1, VOCAB), 1)
    onehot = jnp.concatenate(
        [(iota_v == tok_ref[i]).astype(f32) for i in range(BS)], axis=0)   # (BS, V)
    emb = w_ref[EMB_R0:EMB_R0 + VOCAB, 0:D_MODEL]                           # (V, D)
    x = jnp.dot(onehot, emb, preferred_element_type=f32)                    # (BS, D)

    for l in range(N_LAYERS):   # static unroll; all weights resident in VMEM
        r = LAYER_W_R0 + l * L_W_STRIDE
        wqkv = w_ref[r + WQKV_OFF:r + WQKV_OFF + D_MODEL, 0:3 * D_MODEL]    # (D, 3D)
        wo = w_ref[r + WO_OFF:r + WO_OFF + D_MODEL, 0:D_MODEL]
        w1 = w_ref[r + W1_OFF:r + W1_OFF + D_MODEL, 0:DFF]
        w2 = w_ref[r + W2_OFF:r + W2_OFF + DFF, 0:D_MODEL]

        vb = v_ref[l * L_V_STRIDE:(l + 1) * L_V_STRIDE, :]                  # (8, 128), one aligned load
        bqkv = vb[0:1, 0:3 * D_MODEL]
        bo = vb[1:2, 0:D_MODEL]
        b1 = vb[2:3, 0:DFF]
        b2 = vb[3:4, 0:D_MODEL]
        g1, be1 = vb[4:5, 0:D_MODEL], vb[5:6, 0:D_MODEL]
        g2, be2 = vb[6:7, 0:D_MODEL], vb[7:8, 0:D_MODEL]

        # ---- attention: fused QKV projection (one MXU push) -----------------
        qkv = jnp.dot(x, wqkv, preferred_element_type=f32) + bqkv           # (BS, 3D)
        qkv3 = qkv.reshape(BATCH, SEQ, 3 * D_MODEL)                         # leading-split only

        # Merge (head, batch) into ONE leading batch dim of size H*B so the
        # whole attention is a single batched dot_general pair (no per-head
        # einsum loop).  1/sqrt(d_head) is already folded into wq/bq.
        def heads(off):
            return jnp.concatenate(
                [qkv3[:, :, off + h * D_HEAD: off + (h + 1) * D_HEAD]
                 for h in range(N_HEADS)], axis=0)                          # (H*B, S, Dh)

        q_h = heads(0)
        k_h = heads(D_MODEL)
        v_h = heads(2 * D_MODEL)
        scores = jnp.einsum('bqd,bkd->bqk', q_h, k_h,
                            preferred_element_type=f32)                     # (H*B, S, S)
        probs = _softmax_last(scores)
        ctx = jnp.einsum('bqk,bkd->bqd', probs, v_h,
                         preferred_element_type=f32)                        # (H*B, S, Dh)
        attn = jnp.concatenate(
            [ctx[h * BATCH:(h + 1) * BATCH] for h in range(N_HEADS)],
            axis=-1)                                                        # (B, S, D)
        attn = attn.reshape(BS, D_MODEL)
        attn = jnp.dot(attn, wo, preferred_element_type=f32) + bo

        # residual + LayerNorm (post-norm), ReLU FFN, residual + LayerNorm
        x = _layer_norm(x + attn, g1, be1)
        h1 = jnp.maximum(jnp.dot(x, w1, preferred_element_type=f32) + b1, 0.0)
        ffn = jnp.dot(h1, w2, preferred_element_type=f32) + b2
        x = _layer_norm(x + ffn, g2, be2)
        # TODO(synk): input_recall=False in this config; recall combine would go here.

    ow = w_ref[OUT_W_R0:OUT_W_R0 + D_MODEL, 0:VOCAB]
    ob = v_ref[OUT_B_R0:OUT_B_R0 + 1, 0:VOCAB]
    out_ref[...] = (jnp.dot(x, ow, preferred_element_type=f32) + ob).astype(out_ref.dtype)


def transformer_forward(w_slab, v_slab, tokens):
    """tokens: (B, S) int32 -> logits (B, S, V) float32."""
    B, S = tokens.shape
    tok = tokens.reshape(B * S).astype(jnp.int32)

    logits = pl.pallas_call(
        fused_forward_kernel,
        out_shape=jax.ShapeDtypeStruct((B * S, VOCAB), jnp.float32),
        # Gridless: 3 input DMAs (tokens->SMEM, two weight slabs->VMEM) + 1 output.
        in_specs=[
            pl.BlockSpec(memory_space=pltpu.MemorySpace.SMEM),   # tokens
            pl.BlockSpec(memory_space=pltpu.MemorySpace.VMEM),   # matrices slab
            pl.BlockSpec(memory_space=pltpu.MemorySpace.VMEM),   # vectors slab
        ],
        out_specs=pl.BlockSpec(memory_space=pltpu.MemorySpace.VMEM),
    )(tok, w_slab, v_slab)

    return logits.reshape(B, S, VOCAB)


transformer_forward = jax.jit(transformer_forward)


# ----------------------------- parameter init & packing ---------------------
def init_params(key):
    def nrm(k, shape, scale):
        return scale * jax.random.normal(k, shape, dtype=jnp.float32)

    keys = jax.random.split(key, 2 + N_LAYERS)
    params = {
        "emb": nrm(keys[0], (VOCAB, D_MODEL), 1.0),                      # nn.Embedding
        "out_w": nrm(keys[1], (D_MODEL, VOCAB), 1.0 / D_MODEL ** 0.5),
        "out_b": jnp.zeros((1, VOCAB), jnp.float32),
        "layers": [],
    }
    for l in range(N_LAYERS):
        lk = jax.random.split(keys[2 + l], 6)
        s_d = 1.0 / D_MODEL ** 0.5
        s_f = 1.0 / DFF ** 0.5
        params["layers"].append({
            "wq": nrm(lk[0], (D_MODEL, D_MODEL), s_d), "bq": jnp.zeros((1, D_MODEL), jnp.float32),
            "wk": nrm(lk[1], (D_MODEL, D_MODEL), s_d), "bk": jnp.zeros((1, D_MODEL), jnp.float32),
            "wv": nrm(lk[2], (D_MODEL, D_MODEL), s_d), "bv": jnp.zeros((1, D_MODEL), jnp.float32),
            "wo": nrm(lk[3], (D_MODEL, D_MODEL), s_d), "bo": jnp.zeros((1, D_MODEL), jnp.float32),
            "w1": nrm(lk[4], (D_MODEL, DFF), s_d), "b1": jnp.zeros((1, DFF), jnp.float32),
            "w2": nrm(lk[5], (DFF, D_MODEL), s_f), "b2": jnp.zeros((1, D_MODEL), jnp.float32),
            "ln1_g": jnp.ones((1, D_MODEL), jnp.float32), "ln1_b": jnp.zeros((1, D_MODEL), jnp.float32),
            "ln2_g": jnp.ones((1, D_MODEL), jnp.float32), "ln2_b": jnp.zeros((1, D_MODEL), jnp.float32),
        })
    return params


def pack_params(params):
    """Pack all weights into two lane-padded slabs (done ONCE, not per call)."""
    w = jnp.zeros((W_ROWS, SLAB_LANES), jnp.float32)
    vec = jnp.zeros((V_ROWS, SLAB_LANES), jnp.float32)

    w = w.at[EMB_R0:EMB_R0 + VOCAB, 0:D_MODEL].set(params["emb"])
    for l, lp in enumerate(params["layers"]):
        r = LAYER_W_R0 + l * L_W_STRIDE
        # fold the attention scale into the Q projection (weights and bias)
        wqkv = jnp.concatenate([lp["wq"] * ATTN_SCALE, lp["wk"], lp["wv"]], axis=1)  # (D, 3D)
        bqkv = jnp.concatenate([lp["bq"] * ATTN_SCALE, lp["bk"], lp["bv"]], axis=1)  # (1, 3D)
        w = w.at[r + WQKV_OFF:r + WQKV_OFF + D_MODEL, 0:3 * D_MODEL].set(wqkv)
        w = w.at[r + WO_OFF:r + WO_OFF + D_MODEL, 0:D_MODEL].set(lp["wo"])
        w = w.at[r + W1_OFF:r + W1_OFF + D_MODEL, 0:DFF].set(lp["w1"])
        w = w.at[r + W2_OFF:r + W2_OFF + DFF, 0:D_MODEL].set(lp["w2"])

        vr = l * L_V_STRIDE
        vec = vec.at[vr + 0, 0:3 * D_MODEL].set(bqkv[0])
        vec = vec.at[vr + 1, 0:D_MODEL].set(lp["bo"][0])
        vec = vec.at[vr + 2, 0:DFF].set(lp["b1"][0])
        vec = vec.at[vr + 3, 0:D_MODEL].set(lp["b2"][0])
        vec = vec.at[vr + 4, 0:D_MODEL].set(lp["ln1_g"][0])
        vec = vec.at[vr + 5, 0:D_MODEL].set(lp["ln1_b"][0])
        vec = vec.at[vr + 6, 0:D_MODEL].set(lp["ln2_g"][0])
        vec = vec.at[vr + 7, 0:D_MODEL].set(lp["ln2_b"][0])

    w = w.at[OUT_W_R0:OUT_W_R0 + D_MODEL, 0:VOCAB].set(params["out_w"])
    vec = vec.at[OUT_B_R0, 0:VOCAB].set(params["out_b"][0])
    return w, vec


# ----------------------------- pure-JAX reference ---------------------------
def reference_forward(params, tokens):
    P = jax.lax.Precision.HIGHEST
    x = params["emb"][tokens].reshape(BS, D_MODEL)
    for lp in params["layers"]:
        q = (jnp.dot(x, lp["wq"], precision=P) + lp["bq"]) * ATTN_SCALE
        k = jnp.dot(x, lp["wk"], precision=P) + lp["bk"]
        v = jnp.dot(x, lp["wv"], precision=P) + lp["bv"]
        q = q.reshape(BATCH, SEQ, N_HEADS, D_HEAD)
        k = k.reshape(BATCH, SEQ, N_HEADS, D_HEAD)
        v = v.reshape(BATCH, SEQ, N_HEADS, D_HEAD)
        s = jnp.einsum('bqhd,bkhd->bhqk', q, k, precision=P)
        p = jax.nn.softmax(s, axis=-1)
        ctx = jnp.einsum('bhqk,bkhd->bqhd', p, v, precision=P).reshape(BS, D_MODEL)
        attn = jnp.dot(ctx, lp["wo"], precision=P) + lp["bo"]
        x = _layer_norm(x + attn, lp["ln1_g"], lp["ln1_b"])
        h1 = jnp.maximum(jnp.dot(x, lp["w1"], precision=P) + lp["b1"], 0.0)
        ffn = jnp.dot(h1, lp["w2"], precision=P) + lp["b2"]
        x = _layer_norm(x + ffn, lp["ln2_g"], lp["ln2_b"])
    logits = jnp.dot(x, params["out_w"], precision=P) + params["out_b"]
    return logits.reshape(BATCH, SEQ, VOCAB)


# ----------------------------- main ------------------------------------------
if __name__ == "__main__":
    key = jax.random.PRNGKey(0)
    pkey, dkey = jax.random.split(key)
    params = init_params(pkey)
    w_slab, v_slab = pack_params(params)
    tokens = jax.random.randint(dkey, (BATCH, SEQ), 0, VOCAB, dtype=jnp.int32)

    logits = transformer_forward(w_slab, v_slab, tokens)
    jax.block_until_ready(logits)
    assert logits.shape == (BATCH, SEQ, VOCAB), logits.shape
    assert bool(jnp.all(jnp.isfinite(logits)))

    # correctness vs. pure-JAX reference (approx-reciprocal softmax -> small tol)
    ref = reference_forward(params, tokens)
    err = float(jnp.max(jnp.abs(logits - ref)))
    assert err < 5e-2, f"kernel/reference mismatch: max abs err = {err}"

    print("KERNEL_OK")
</pallas_src>

<mosaic_0001>
module attributes {stable_mosaic.version = 11 : i64} {
  func.func @fused_forward_kernel(%arg0: memref<16xi32, #tpu.memory_space<smem>>, %arg1: memref<368x128xf32, #tpu.memory_space<vmem>>, %arg2: memref<24x128xf32, #tpu.memory_space<vmem>>, %arg3: memref<16x16xf32, #tpu.memory_space<vmem>>) attributes {dimension_semantics = [], scalar_prefetch = 0 : i64, scratch_operands = 0 : i64, tpu.core_type = #tpu.core_type<tc>} {
    %0 = tpu.iota {dimensions = array<i32: 1>} : vector<1x16xi32>
    %c0 = arith.constant 0 : index
    %1 = memref.load %arg0[%c0] : memref<16xi32, #tpu.memory_space<smem>>
    %2 = vector.broadcast %1 : i32 to vector<1x16xi32>
    %3 = arith.cmpi eq, %0, %2 : vector<1x16xi32>
    %4 = arith.extui %3 : vector<1x16xi1> to vector<1x16xi32>
    %5 = arith.sitofp %4 : vector<1x16xi32> to vector<1x16xf32>
    %c1 = arith.constant 1 : index
    %6 = memref.load %arg0[%c1] : memref<16xi32, #tpu.memory_space<smem>>
    %7 = vector.broadcast %6 : i32 to vector<1x16xi32>
    %8 = arith.cmpi eq, %0, %7 : vector<1x16xi32>
    %9 = arith.extui %8 : vector<1x16xi1> to vector<1x16xi32>
    %10 = arith.sitofp %9 : vector<1x16xi32> to vector<1x16xf32>
    %c2 = arith.constant 2 : index
    %11 = memref.load %arg0[%c2] : memref<16xi32, #tpu.memory_space<smem>>
    %12 = vector.broadcast %11 : i32 to vector<1x16xi32>
    %13 = arith.cmpi eq, %0, %12 : vector<1x16xi32>
    %14 = arith.extui %13 : vector<1x16xi1> to vector<1x16xi32>
    %15 = arith.sitofp %14 : vector<1x16xi32> to vector<1x16xf32>
    %c3 = arith.constant 3 : index
    %16 = memref.load %arg0[%c3] : memref<16xi32, #tpu.memory_space<smem>>
    %17 = vector.broadcast %16 : i32 to vector<1x16xi32>
    %18 = arith.cmpi eq, %0, %17 : vector<1x16xi32>
    %19 = arith.extui %18 : vector<1x16xi1> to vector<1x16xi32>
    %20 = arith.sitofp %19 : vector<1x16xi32> to vector<1x16xf32>
    %c4 = arith.constant 4 : index
    %21 = memref.load %arg0[%c4] : memref<16xi32, #tpu.memory_space<smem>>
    %22 = vector.broadcast %21 : i32 to vector<1x16xi32>
    %23 = arith.cmpi eq, %0, %22 : vector<1x16xi32>
    %24 = arith.extui %23 : vector<1x16xi1> to vector<1x16xi32>
    %25 = arith.sitofp %24 : vector<1x16xi32> to vector<1x16xf32>
    %c5 = arith.constant 5 : index
    %26 = memref.load %arg0[%c5] : memref<16xi32, #tpu.memory_space<smem>>
    %27 = vector.broadcast %26 : i32 to vector<1x16xi32>
    %28 = arith.cmpi eq, %0, %27 : vector<1x16xi32>
    %29 = arith.extui %28 : vector<1x16xi1> to vector<1x16xi32>
    %30 = arith.sitofp %29 : vector<1x16xi32> to vector<1x16xf32>
    %c6 = arith.constant 6 : index
    %31 = memref.load %arg0[%c6] : memref<16xi32, #tpu.memory_space<smem>>
    %32 = vector.broadcast %31 : i32 to vector<1x16xi32>
    %33 = arith.cmpi eq, %0, %32 : vector<1x16xi32>
    %34 = arith.extui %33 : vector<1x16xi1> to vector<1x16xi32>
    %35 = arith.sitofp %34 : vector<1x16xi32> to vector<1x16xf32>
    %c7 = arith.constant 7 : index
    %36 = memref.load %arg0[%c7] : memref<16xi32, #tpu.memory_space<smem>>
    %37 = vector.broadcast %36 : i32 to vector<1x16xi32>
    %38 = arith.cmpi eq, %0, %37 : vector<1x16xi32>
    %39 = arith.extui %38 : vector<1x16xi1> to vector<1x16xi32>
    %40 = arith.sitofp %39 : vector<1x16xi32> to vector<1x16xf32>
    %c8 = arith.constant 8 : index
    %41 = memref.load %arg0[%c8] : memref<16xi32, #tpu.memory_space<smem>>
    %42 = vector.broadcast %41 : i32 to vector<1x16xi32>
    %43 = arith.cmpi eq, %0, %42 : vector<1x16xi32>
    %44 = arith.extui %43 : vector<1x16xi1> to vector<1x16xi32>
    %45 = arith.sitofp %44 : vector<1x16xi32> to vector<1x16xf32>
    %c9 = arith.constant 9 : index
    %46 = memref.load %arg0[%c9] : memref<16xi32, #tpu.memory_space<smem>>
    %47 = vector.broadcast %46 : i32 to vector<1x16xi32>
    %48 = arith.cmpi eq, %0, %47 : vector<1x16xi32>
    %49 = arith.extui %48 : vector<1x16xi1> to vector<1x16xi32>
    %50 = arith.sitofp %49 : vector<1x16xi32> to vector<1x16xf32>
    %c10 = arith.constant 10 : index
    %51 = memref.load %arg0[%c10] : memref<16xi32, #tpu.memory_space<smem>>
    %52 = vector.broadcast %51 : i32 to vector<1x16xi32>
    %53 = arith.cmpi eq, %0, %52 : vector<1x16xi32>
    %54 = arith.extui %53 : vector<1x16xi1> to vector<1x16xi32>
    %55 = arith.sitofp %54 : vector<1x16xi32> to vector<1x16xf32>
    %c11 = arith.constant 11 : index
    %56 = memref.load %arg0[%c11] : memref<16xi32, #tpu.memory_space<smem>>
    %57 = vector.broadcast %56 : i32 to vector<1x16xi32>
    %58 = arith.cmpi eq, %0, %57 : vector<1x16xi32>
    %59 = arith.extui %58 : vector<1x16xi1> to vector<1x16xi32>
    %60 = arith.sitofp %59 : vector<1x16xi32> to vector<1x16xf32>
    %c12 = arith.constant 12 : index
    %61 = memref.load %arg0[%c12] : memref<16xi32, #tpu.memory_space<smem>>
    %62 = vector.broadcast %61 : i32 to vector<1x16xi32>
    %63 = arith.cmpi eq, %0, %62 : vector<1x16xi32>
    %64 = arith.extui %63 : vector<1x16xi1> to vector<1x16xi32>
    %65 = arith.sitofp %64 : vector<1x16xi32> to vector<1x16xf32>
    %c13 = arith.constant 13 : index
    %66 = memref.load %arg0[%c13] : memref<16xi32, #tpu.memory_space<smem>>
    %67 = vector.broadcast %66 : i32 to vector<1x16xi32>
    %68 = arith.cmpi eq, %0, %67 : vector<1x16xi32>
    %69 = arith.extui %68 : vector<1x16xi1> to vector<1x16xi32>
    %70 = arith.sitofp %69 : vector<1x16xi32> to vector<1x16xf32>
    %c14 = arith.constant 14 : index
    %71 = memref.load %arg0[%c14] : memref<16xi32, #tpu.memory_space<smem>>
    %72 = vector.broadcast %71 : i32 to vector<1x16xi32>
    %73 = arith.cmpi eq, %0, %72 : vector<1x16xi32>
    %74 = arith.extui %73 : vector<1x16xi1> to vector<1x16xi32>
    %75 = arith.sitofp %74 : vector<1x16xi32> to vector<1x16xf32>
    %c15 = arith.constant 15 : index
    %76 = memref.load %arg0[%c15] : memref<16xi32, #tpu.memory_space<smem>>
    %77 = vector.broadcast %76 : i32 to vector<1x16xi32>
    %78 = arith.cmpi eq, %0, %77 : vector<1x16xi32>
    %79 = arith.extui %78 : vector<1x16xi1> to vector<1x16xi32>
    %80 = arith.sitofp %79 : vector<1x16xi32> to vector<1x16xf32>
    %81 = tpu.concatenate %5, %10, %15, %20, %25, %30, %35, %40, %45, %50, %55, %60, %65, %70, %75, %80 in 0 : vector<1x16xf32>, vector<1x16xf32>, vector<1x16xf32>, vector<1x16xf32>, vector<1x16xf32>, vector<1x16xf32>, vector<1x16xf32>, vector<1x16xf32>, vector<1x16xf32>, vector<1x16xf32>, vector<1x16xf32>, vector<1x16xf32>, vector<1x16xf32>, vector<1x16xf32>, vector<1x16xf32>, vector<1x16xf32> -> vector<16x16xf32>
    %c0_0 = arith.constant 0 : index
    %c0_1 = arith.constant 0 : index
    %82 = vector.load %arg1[%c0_0, %c0_1] : memref<368x128xf32, #tpu.memory_space<vmem>>, vector<16x32xf32>
    %cst = arith.constant dense<0.000000e+00> : vector<16x32xf32>
    %83 = tpu.matmul %81, %82, %cst {dimension_numbers = #tpu.dot_dimension_numbers<[1], [0], [0], [1], [0, 0, 1, 1], [], []>} : vector<16x16xf32>, vector<16x32xf32>, vector<16x32xf32> -> vector<16x32xf32>
    %c16 = arith.constant 16 : index
    %c0_2 = arith.constant 0 : index
    %84 = vector.load %arg1[%c16, %c0_2] : memref<368x128xf32, #tpu.memory_space<vmem>>, vector<32x96xf32>
    %c48 = arith.constant 48 : index
    %c0_3 = arith.constant 0 : index
    %85 = vector.load %arg1[%c48, %c0_3] : memref<368x128xf32, #tpu.memory_space<vmem>>, vector<32x32xf32>
    %c80 = arith.constant 80 : index
    %c0_4 = arith.constant 0 : index
    %86 = vector.load %arg1[%c80, %c0_4] : memref<368x128xf32, #tpu.memory_space<vmem>>, vector<32x64xf32>
    %c112 = arith.constant 112 : index
    %c0_5 = arith.constant 0 : index
    %87 = vector.load %arg1[%c112, %c0_5] : memref<368x128xf32, #tpu.memory_space<vmem>>, vector<64x32xf32>
    %c0_6 = arith.constant 0 : index
    %c0_7 = arith.constant 0 : index
    %88 = vector.load %arg2[%c0_6, %c0_7] : memref<24x128xf32, #tpu.memory_space<vmem>>, vector<8x128xf32>
    %89 = vector.extract_strided_slice %88 {offsets = [0, 0], sizes = [1, 96], strides = [1, 1]} : vector<8x128xf32> to vector<1x96xf32>
    %90 = vector.extract_strided_slice %88 {offsets = [1, 0], sizes = [1, 32], strides = [1, 1]} : vector<8x128xf32> to vector<1x32xf32>
    %91 = vector.extract_strided_slice %88 {offsets = [2, 0], sizes = [1, 64], strides = [1, 1]} : vector<8x128xf32> to vector<1x64xf32>
    %92 = vector.extract_strided_slice %88 {offsets = [3, 0], sizes = [1, 32], strides = [1, 1]} : vector<8x128xf32> to vector<1x32xf32>
    %93 = vector.extract_strided_slice %88 {offsets = [4, 0], sizes = [1, 32], strides = [1, 1]} : vector<8x128xf32> to vector<1x32xf32>
    %94 = vector.extract_strided_slice %88 {offsets = [5, 0], sizes = [1, 32], strides = [1, 1]} : vector<8x128xf32> to vector<1x32xf32>
    %95 = vector.extract_strided_slice %88 {offsets = [6, 0], sizes = [1, 32], strides = [1, 1]} : vector<8x128xf32> to vector<1x32xf32>
    %96 = vector.extract_strided_slice %88 {offsets = [7, 0], sizes = [1, 32], strides = [1, 1]} : vector<8x128xf32> to vector<1x32xf32>
    %cst_8 = arith.constant dense<0.000000e+00> : vector<16x96xf32>
    %97 = tpu.matmul %83, %84, %cst_8 {dimension_numbers = #tpu.dot_dimension_numbers<[1], [0], [0], [1], [0, 0, 1, 1], [], []>} : vector<16x32xf32>, vector<32x96xf32>, vector<16x96xf32> -> vector<16x96xf32>
    %98 = vector.broadcast %89 : vector<1x96xf32> to vector<16x96xf32>
    %99 = arith.addf %97, %98 : vector<16x96xf32>
    %100 = vector.shape_cast %99 : vector<16x96xf32> to vector<2x8x96xf32>
    %101 = vector.extract_strided_slice %100 {offsets = [0, 0, 0], sizes = [2, 8, 8], strides = [1, 1, 1]} : vector<2x8x96xf32> to vector<2x8x8xf32>
    %102 = vector.extract_strided_slice %100 {offsets = [0, 0, 8], sizes = [2, 8, 8], strides = [1, 1, 1]} : vector<2x8x96xf32> to vector<2x8x8xf32>
    %103 = vector.extract_strided_slice %100 {offsets = [0, 0, 16], sizes = [2, 8, 8], strides = [1, 1, 1]} : vector<2x8x96xf32> to vector<2x8x8xf32>
    %104 = vector.extract_strided_slice %100 {offsets = [0, 0, 24], sizes = [2, 8, 8], strides = [1, 1, 1]} : vector<2x8x96xf32> to vector<2x8x8xf32>
    %105 = tpu.concatenate %101, %102, %103, %104 in 0 : vector<2x8x8xf32>, vector<2x8x8xf32>, vector<2x8x8xf32>, vector<2x8x8xf32> -> vector<8x8x8xf32>
    %106 = vector.extract_strided_slice %100 {offsets = [0, 0, 32], sizes = [2, 8, 8], strides = [1, 1, 1]} : vector<2x8x96xf32> to vector<2x8x8xf32>
    %107 = vector.extract_strided_slice %100 {offsets = [0, 0, 40], sizes = [2, 8, 8], strides = [1, 1, 1]} : vector<2x8x96xf32> to vector<2x8x8xf32>
    %108 = vector.extract_strided_slice %100 {offsets = [0, 0, 48], sizes = [2, 8, 8], strides = [1, 1, 1]} : vector<2x8x96xf32> to vector<2x8x8xf32>
    %109 = vector.extract_strided_slice %100 {offsets = [0, 0, 56], sizes = [2, 8, 8], strides = [1, 1, 1]} : vector<2x8x96xf32> to vector<2x8x8xf32>
    %110 = tpu.concatenate %106, %107, %108, %109 in 0 : vector<2x8x8xf32>, vector<2x8x8xf32>, vector<2x8x8xf32>, vector<2x8x8xf32> -> vector<8x8x8xf32>
    %111 = vector.extract_strided_slice %100 {offsets = [0, 0, 64], sizes = [2, 8, 8], strides = [1, 1, 1]} : vector<2x8x96xf32> to vector<2x8x8xf32>
    %112 = vector.extract_strided_slice %100 {offsets = [0, 0, 72], sizes = [2, 8, 8], strides = [1, 1, 1]} : vector<2x8x96xf32> to vector<2x8x8xf32>
    %113 = vector.extract_strided_slice %100 {offsets = [0, 0, 80], sizes = [2, 8, 8], strides = [1, 1, 1]} : vector<2x8x96xf32> to vector<2x8x8xf32>
    %114 = vector.extract_strided_slice %100 {offsets = [0, 0, 88], sizes = [2, 8, 8], strides = [1, 1, 1]} : vector<2x8x96xf32> to vector<2x8x8xf32>
    %115 = tpu.concatenate %111, %112, %113, %114 in 0 : vector<2x8x8xf32>, vector<2x8x8xf32>, vector<2x8x8xf32>, vector<2x8x8xf32> -> vector<8x8x8xf32>
    "tpu.trace_start"() <{level = 10 : i32, message = "bqd,bkd->bqk"}> : () -> ()
    %cst_9 = arith.constant dense<0.000000e+00> : vector<8x8x8xf32>
    %116 = tpu.matmul %105, %110, %cst_9 {dimension_numbers = #tpu.dot_dimension_numbers<[2], [2], [1], [1], [0, 0, 0, 1, 1, 1], [0], [0]>} : vector<8x8x8xf32>, vector<8x8x8xf32>, vector<8x8x8xf32> -> vector<8x8x8xf32>
    "tpu.trace_stop"() : () -> ()
    %cst_10 = arith.constant dense<0xFF800000> : vector<8x8xf32>
    %117 = vector.multi_reduction <maximumf>, %116, %cst_10 [2] : vector<8x8x8xf32> to vector<8x8xf32>
    %118 = vector.shape_cast %117 : vector<8x8xf32> to vector<8x8x1xf32>
    %119 = vector.broadcast %118 : vector<8x8x1xf32> to vector<8x8x8xf32>
    %120 = arith.subf %116, %119 : vector<8x8x8xf32>
    %121 = math.exp %120 : vector<8x8x8xf32>
    %cst_11 = arith.constant dense<0.000000e+00> : vector<8x8xf32>
    %122 = vector.multi_reduction <add>, %121, %cst_11 [2] : vector<8x8x8xf32> to vector<8x8xf32>
    %123 = vector.shape_cast %122 : vector<8x8xf32> to vector<8x8x1xf32>
    %124 = tpu.reciprocal %123 {approx = true} : vector<8x8x1xf32> -> vector<8x8x1xf32>
    %125 = vector.broadcast %124 : vector<8x8x1xf32> to vector<8x8x8xf32>
    %126 = arith.mulf %121, %125 : vector<8x8x8xf32>
    "tpu.trace_start"() <{level = 10 : i32, message = "bqk,bkd->bqd"}> : () -> ()
    %cst_12 = arith.constant dense<0.000000e+00> : vector<8x8x8xf32>
    %127 = tpu.matmul %126, %115, %cst_12 {dimension_numbers = #tpu.dot_dimension_numbers<[2], [1], [1], [2], [0, 0, 0, 1, 1, 2], [0], [0]>} : vector<8x8x8xf32>, vector<8x8x8xf32>, vector<8x8x8xf32> -> vector<8x8x8xf32>
    "tpu.trace_stop"() : () -> ()
    %128 = vector.extract_strided_slice %127 {offsets = [0, 0, 0], sizes = [2, 8, 8], strides = [1, 1, 1]} : vector<8x8x8xf32> to vector<2x8x8xf32>
    %129 = vector.extract_strided_slice %127 {offsets = [2, 0, 0], sizes = [2, 8, 8], strides = [1, 1, 1]} : vector<8x8x8xf32> to vector<2x8x8xf32>
    %130 = vector.extract_strided_slice %127 {offsets = [4, 0, 0], sizes = [2, 8, 8], strides = [1, 1, 1]} : vector<8x8x8xf32> to vector<2x8x8xf32>
    %131 = vector.extract_strided_slice %127 {offsets = [6, 0, 0], sizes = [2, 8, 8], strides = [1, 1, 1]} : vector<8x8x8xf32> to vector<2x8x8xf32>
    %132 = tpu.concatenate %128, %129, %130, %131 in 2 : vector<2x8x8xf32>, vector<2x8x8xf32>, vector<2x8x8xf32>, vector<2x8x8xf32> -> vector<2x8x32xf32>
    %133 = vector.shape_cast %132 : vector<2x8x32xf32> to vector<16x32xf32>
    %cst_13 = arith.constant dense<0.000000e+00> : vector<16x32xf32>
    %134 = tpu.matmul %133, %85, %cst_13 {dimension_numbers = #tpu.dot_dimension_numbers<[1], [0], [0], [1], [0, 0, 1, 1], [], []>} : vector<16x32xf32>, vector<32x32xf32>, vector<16x32xf32> -> vector<16x32xf32>
    %135 = vector.broadcast %90 : vector<1x32xf32> to vector<16x32xf32>
    %136 = arith.addf %134, %135 : vector<16x32xf32>
    %137 = arith.addf %83, %136 : vector<16x32xf32>
    %cst_14 = arith.constant dense<0.000000e+00> : vector<16xf32>
    %138 = vector.multi_reduction <add>, %137, %cst_14 [1] : vector<16x32xf32> to vector<16xf32>
    %139 = vector.shape_cast %138 : vector<16xf32> to vector<16x1xf32>
    %cst_15 = arith.constant 3.200000e+01 : f32
    %140 = vector.broadcast %cst_15 : f32 to vector<16x1xf32>
    %141 = arith.divf %139, %140 : vector<16x1xf32>
    %142 = vector.broadcast %141 : vector<16x1xf32> to vector<16x32xf32>
    %143 = arith.subf %137, %142 : vector<16x32xf32>
    %144 = arith.mulf %143, %143 : vector<16x32xf32>
    %cst_16 = arith.constant dense<0.000000e+00> : vector<16xf32>
    %145 = vector.multi_reduction <add>, %144, %cst_16 [1] : vector<16x32xf32> to vector<16xf32>
    %146 = vector.shape_cast %145 : vector<16xf32> to vector<16x1xf32>
    %cst_17 = arith.constant 3.200000e+01 : f32
    %147 = vector.broadcast %cst_17 : f32 to vector<16x1xf32>
    %148 = arith.divf %146, %147 : vector<16x1xf32>
    %149 = vector.broadcast %141 : vector<16x1xf32> to vector<16x32xf32>
    %150 = arith.subf %137, %149 : vector<16x32xf32>
    %cst_18 = arith.constant 9.99999974E-6 : f32
    %151 = vector.broadcast %cst_18 : f32 to vector<16x1xf32>
    %152 = arith.addf %148, %151 : vector<16x1xf32>
    %153 = math.rsqrt %152 : vector<16x1xf32>
    %154 = vector.broadcast %153 : vector<16x1xf32> to vector<16x32xf32>
    %155 = arith.mulf %150, %154 : vector<16x32xf32>
    %156 = vector.broadcast %93 : vector<1x32xf32> to vector<16x32xf32>
    %157 = arith.mulf %155, %156 : vector<16x32xf32>
    %158 = vector.broadcast %94 : vector<1x32xf32> to vector<16x32xf32>
    %159 = arith.addf %157, %158 : vector<16x32xf32>
    %cst_19 = arith.constant dense<0.000000e+00> : vector<16x64xf32>
    %160 = tpu.matmul %159, %86, %cst_19 {dimension_numbers = #tpu.dot_dimension_numbers<[1], [0], [0], [1], [0, 0, 1, 1], [], []>} : vector<16x32xf32>, vector<32x64xf32>, vector<16x64xf32> -> vector<16x64xf32>
    %161 = vector.broadcast %91 : vector<1x64xf32> to vector<16x64xf32>
    %162 = arith.addf %160, %161 : vector<16x64xf32>
    %cst_20 = arith.constant 0.000000e+00 : f32
    %163 = vector.broadcast %cst_20 : f32 to vector<16x64xf32>
    %164 = arith.maximumf %162, %163 : vector<16x64xf32>
    %cst_21 = arith.constant dense<0.000000e+00> : vector<16x32xf32>
    %165 = tpu.matmul %164, %87, %cst_21 {dimension_numbers = #tpu.dot_dimension_numbers<[1], [0], [0], [1], [0, 0, 1, 1], [], []>} : vector<16x64xf32>, vector<64x32xf32>, vector<16x32xf32> -> vector<16x32xf32>
    %166 = vector.broadcast %92 : vector<1x32xf32> to vector<16x32xf32>
    %167 = arith.addf %165, %166 : vector<16x32xf32>
    %168 = arith.addf %159, %167 : vector<16x32xf32>
    %cst_22 = arith.constant dense<0.000000e+00> : vector<16xf32>
    %169 = vector.multi_reduction <add>, %168, %cst_22 [1] : vector<16x32xf32> to vector<16xf32>
    %170 = vector.shape_cast %169 : vector<16xf32> to vector<16x1xf32>
    %cst_23 = arith.constant 3.200000e+01 : f32
    %171 = vector.broadcast %cst_23 : f32 to vector<16x1xf32>
    %172 = arith.divf %170, %171 : vector<16x1xf32>
    %173 = vector.broadcast %172 : vector<16x1xf32> to vector<16x32xf32>
    %174 = arith.subf %168, %173 : vector<16x32xf32>
    %175 = arith.mulf %174, %174 : vector<16x32xf32>
    %cst_24 = arith.constant dense<0.000000e+00> : vector<16xf32>
    %176 = vector.multi_reduction <add>, %175, %cst_24 [1] : vector<16x32xf32> to vector<16xf32>
    %177 = vector.shape_cast %176 : vector<16xf32> to vector<16x1xf32>
    %cst_25 = arith.constant 3.200000e+01 : f32
    %178 = vector.broadcast %cst_25 : f32 to vector<16x1xf32>
    %179 = arith.divf %177, %178 : vector<16x1xf32>
    %180 = vector.broadcast %172 : vector<16x1xf32> to vector<16x32xf32>
    %181 = arith.subf %168, %180 : vector<16x32xf32>
    %cst_26 = arith.constant 9.99999974E-6 : f32
    %182 = vector.broadcast %cst_26 : f32 to vector<16x1xf32>
    %183 = arith.addf %179, %182 : vector<16x1xf32>
    %184 = math.rsqrt %183 : vector<16x1xf32>
    %185 = vector.broadcast %184 : vector<16x1xf32> to vector<16x32xf32>
    %186 = arith.mulf %181, %185 : vector<16x32xf32>
    %187 = vector.broadcast %95 : vector<1x32xf32> to vector<16x32xf32>
    %188 = arith.mulf %186, %187 : vector<16x32xf32>
    %189 = vector.broadcast %96 : vector<1x32xf32> to vector<16x32xf32>
    %190 = arith.addf %188, %189 : vector<16x32xf32>
    %c176 = arith.constant 176 : index
    %c0_27 = arith.constant 0 : index
    %191 = vector.load %arg1[%c176, %c0_27] : memref<368x128xf32, #tpu.memory_space<vmem>>, vector<32x96xf32>
    %c208 = arith.constant 208 : index
    %c0_28 = arith.constant 0 : index
    %192 = vector.load %arg1[%c208, %c0_28] : memref<368x128xf32, #tpu.memory_space<vmem>>, vector<32x32xf32>
    %c240 = arith.constant 240 : index
    %c0_29 = arith.constant 0 : index
    %193 = vector.load %arg1[%c240, %c0_29] : memref<368x128xf32, #tpu.memory_space<vmem>>, vector<32x64xf32>
    %c272 = arith.constant 272 : index
    %c0_30 = arith.constant 0 : index
    %194 = vector.load %arg1[%c272, %c0_30] : memref<368x128xf32, #tpu.memory_space<vmem>>, vector<64x32xf32>
    %c8_31 = arith.constant 8 : index
    %c0_32 = arith.constant 0 : index
    %195 = vector.load %arg2[%c8_31, %c0_32] : memref<24x128xf32, #tpu.memory_space<vmem>>, vector<8x128xf32>
    %196 = vector.extract_strided_slice %195 {offsets = [0, 0], sizes = [1, 96], strides = [1, 1]} : vector<8x128xf32> to vector<1x96xf32>
    %197 = vector.extract_strided_slice %195 {offsets = [1, 0], sizes = [1, 32], strides = [1, 1]} : vector<8x128xf32> to vector<1x32xf32>
    %198 = vector.extract_strided_slice %195 {offsets = [2, 0], sizes = [1, 64], strides = [1, 1]} : vector<8x128xf32> to vector<1x64xf32>
    %199 = vector.extract_strided_slice %195 {offsets = [3, 0], sizes = [1, 32], strides = [1, 1]} : vector<8x128xf32> to vector<1x32xf32>
    %200 = vector.extract_strided_slice %195 {offsets = [4, 0], sizes = [1, 32], strides = [1, 1]} : vector<8x128xf32> to vector<1x32xf32>
    %201 = vector.extract_strided_slice %195 {offsets = [5, 0], sizes = [1, 32], strides = [1, 1]} : vector<8x128xf32> to vector<1x32xf32>
    %202 = vector.extract_strided_slice %195 {offsets = [6, 0], sizes = [1, 32], strides = [1, 1]} : vector<8x128xf32> to vector<1x32xf32>
    %203 = vector.extract_strided_slice %195 {offsets = [7, 0], sizes = [1, 32], strides = [1, 1]} : vector<8x128xf32> to vector<1x32xf32>
    %cst_33 = arith.constant dense<0.000000e+00> : vector<16x96xf32>
    %204 = tpu.matmul %190, %191, %cst_33 {dimension_numbers = #tpu.dot_dimension_numbers<[1], [0], [0], [1], [0, 0, 1, 1], [], []>} : vector<16x32xf32>, vector<32x96xf32>, vector<16x96xf32> -> vector<16x96xf32>
    %205 = vector.broadcast %196 : vector<1x96xf32> to vector<16x96xf32>
    %206 = arith.addf %204, %205 : vector<16x96xf32>
    %207 = vector.shape_cast %206 : vector<16x96xf32> to vector<2x8x96xf32>
    %208 = vector.extract_strided_slice %207 {offsets = [0, 0, 0], sizes = [2, 8, 8], strides = [1, 1, 1]} : vector<2x8x96xf32> to vector<2x8x8xf32>
    %209 = vector.extract_strided_slice %207 {offsets = [0, 0, 8], sizes = [2, 8, 8], strides = [1, 1, 1]} : vector<2x8x96xf32> to vector<2x8x8xf32>
    %210 = vector.extract_strided_slice %207 {offsets = [0, 0, 16], sizes = [2, 8, 8], strides = [1, 1, 1]} : vector<2x8x96xf32> to vector<2x8x8xf32>
    %211 = vector.extract_strided_slice %207 {offsets = [0, 0, 24], sizes = [2, 8, 8], strides = [1, 1, 1]} : vector<2x8x96xf32> to vector<2x8x8xf32>
    %212 = tpu.concatenate %208, %209, %210, %211 in 0 : vector<2x8x8xf32>, vector<2x8x8xf32>, vector<2x8x8xf32>, vector<2x8x8xf32> -> vector<8x8x8xf32>
    %213 = vector.extract_strided_slice %207 {offsets = [0, 0, 32], sizes = [2, 8, 8], strides = [1, 1, 1]} : vector<2x8x96xf32> to vector<2x8x8xf32>
    %214 = vector.extract_strided_slice %207 {offsets = [0, 0, 40], sizes = [2, 8, 8], strides = [1, 1, 1]} : vector<2x8x96xf32> to vector<2x8x8xf32>
    %215 = vector.extract_strided_slice %207 {offsets = [0, 0, 48], sizes = [2, 8, 8], strides = [1, 1, 1]} : vector<2x8x96xf32> to vector<2x8x8xf32>
    %216 = vector.extract_strided_slice %207 {offsets = [0, 0, 56], sizes = [2, 8, 8], strides = [1, 1, 1]} : vector<2x8x96xf32> to vector<2x8x8xf32>
    %217 = tpu.concatenate %213, %214, %215, %216 in 0 : vector<2x8x8xf32>, vector<2x8x8xf32>, vector<2x8x8xf32>, vector<2x8x8xf32> -> vector<8x8x8xf32>
    %218 = vector.extract_strided_slice %207 {offsets = [0, 0, 64], sizes = [2, 8, 8], strides = [1, 1, 1]} : vector<2x8x96xf32> to vector<2x8x8xf32>
    %219 = vector.extract_strided_slice %207 {offsets = [0, 0, 72], sizes = [2, 8, 8], strides = [1, 1, 1]} : vector<2x8x96xf32> to vector<2x8x8xf32>
    %220 = vector.extract_strided_slice %207 {offsets = [0, 0, 80], sizes = [2, 8, 8], strides = [1, 1, 1]} : vector<2x8x96xf32> to vector<2x8x8xf32>
    %221 = vector.extract_strided_slice %207 {offsets = [0, 0, 88], sizes = [2, 8, 8], strides = [1, 1, 1]} : vector<2x8x96xf32> to vector<2x8x8xf32>
    %222 = tpu.concatenate %218, %219, %220, %221 in 0 : vector<2x8x8xf32>, vector<2x8x8xf32>, vector<2x8x8xf32>, vector<2x8x8xf32> -> vector<8x8x8xf32>
    "tpu.trace_start"() <{level = 10 : i32, message = "bqd,bkd->bqk"}> : () -> ()
    %cst_34 = arith.constant dense<0.000000e+00> : vector<8x8x8xf32>
    %223 = tpu.matmul %212, %217, %cst_34 {dimension_numbers = #tpu.dot_dimension_numbers<[2], [2], [1], [1], [0, 0, 0, 1, 1, 1], [0], [0]>} : vector<8x8x8xf32>, vector<8x8x8xf32>, vector<8x8x8xf32> -> vector<8x8x8xf32>
    "tpu.trace_stop"() : () -> ()
    %cst_35 = arith.constant dense<0xFF800000> : vector<8x8xf32>
    %224 = vector.multi_reduction <maximumf>, %223, %cst_35 [2] : vector<8x8x8xf32> to vector<8x8xf32>
    %225 = vector.shape_cast %224 : vector<8x8xf32> to vector<8x8x1xf32>
    %226 = vector.broadcast %225 : vector<8x8x1xf32> to vector<8x8x8xf32>
    %227 = arith.subf %223, %226 : vector<8x8x8xf32>
    %228 = math.exp %227 : vector<8x8x8xf32>
    %cst_36 = arith.constant dense<0.000000e+00> : vector<8x8xf32>
    %229 = vector.multi_reduction <add>, %228, %cst_36 [2] : vector<8x8x8xf32> to vector<8x8xf32>
    %230 = vector.shape_cast %229 : vector<8x8xf32> to vector<8x8x1xf32>
    %231 = tpu.reciprocal %230 {approx = true} : vector<8x8x1xf32> -> vector<8x8x1xf32>
    %232 = vector.broadcast %231 : vector<8x8x1xf32> to vector<8x8x8xf32>
    %233 = arith.mulf %228, %232 : vector<8x8x8xf32>
    "tpu.trace_start"() <{level = 10 : i32, message = "bqk,bkd->bqd"}> : () -> ()
    %cst_37 = arith.constant dense<0.000000e+00> : vector<8x8x8xf32>
    %234 = tpu.matmul %233, %222, %cst_37 {dimension_numbers = #tpu.dot_dimension_numbers<[2], [1], [1], [2], [0, 0, 0, 1, 1, 2], [0], [0]>} : vector<8x8x8xf32>, vector<8x8x8xf32>, vector<8x8x8xf32> -> vector<8x8x8xf32>
    "tpu.trace_stop"() : () -> ()
    %235 = vector.extract_strided_slice %234 {offsets = [0, 0, 0], sizes = [2, 8, 8], strides = [1, 1, 1]} : vector<8x8x8xf32> to vector<2x8x8xf32>
    %236 = vector.extract_strided_slice %234 {offsets = [2, 0, 0], sizes = [2, 8, 8], strides = [1, 1, 1]} : vector<8x8x8xf32> to vector<2x8x8xf32>
    %237 = vector.extract_strided_slice %234 {offsets = [4, 0, 0], sizes = [2, 8, 8], strides = [1, 1, 1]} : vector<8x8x8xf32> to vector<2x8x8xf32>
    %238 = vector.extract_strided_slice %234 {offsets = [6, 0, 0], sizes = [2, 8, 8], strides = [1, 1, 1]} : vector<8x8x8xf32> to vector<2x8x8xf32>
    %239 = tpu.concatenate %235, %236, %237, %238 in 2 : vector<2x8x8xf32>, vector<2x8x8xf32>, vector<2x8x8xf32>, vector<2x8x8xf32> -> vector<2x8x32xf32>
    %240 = vector.shape_cast %239 : vector<2x8x32xf32> to vector<16x32xf32>
    %cst_38 = arith.constant dense<0.000000e+00> : vector<16x32xf32>
    %241 = tpu.matmul %240, %192, %cst_38 {dimension_numbers = #tpu.dot_dimension_numbers<[1], [0], [0], [1], [0, 0, 1, 1], [], []>} : vector<16x32xf32>, vector<32x32xf32>, vector<16x32xf32> -> vector<16x32xf32>
    %242 = vector.broadcast %197 : vector<1x32xf32> to vector<16x32xf32>
    %243 = arith.addf %241, %242 : vector<16x32xf32>
    %244 = arith.addf %190, %243 : vector<16x32xf32>
    %cst_39 = arith.constant dense<0.000000e+00> : vector<16xf32>
    %245 = vector.multi_reduction <add>, %244, %cst_39 [1] : vector<16x32xf32> to vector<16xf32>
    %246 = vector.shape_cast %245 : vector<16xf32> to vector<16x1xf32>
    %cst_40 = arith.constant 3.200000e+01 : f32
    %247 = vector.broadcast %cst_40 : f32 to vector<16x1xf32>
    %248 = arith.divf %246, %247 : vector<16x1xf32>
    %249 = vector.broadcast %248 : vector<16x1xf32> to vector<16x32xf32>
    %250 = arith.subf %244, %249 : vector<16x32xf32>
    %251 = arith.mulf %250, %250 : vector<16x32xf32>
    %cst_41 = arith.constant dense<0.000000e+00> : vector<16xf32>
    %252 = vector.multi_reduction <add>, %251, %cst_41 [1] : vector<16x32xf32> to vector<16xf32>
    %253 = vector.shape_cast %252 : vector<16xf32> to vector<16x1xf32>
    %cst_42 = arith.constant 3.200000e+01 : f32
    %254 = vector.broadcast %cst_42 : f32 to vector<16x1xf32>
    %255 = arith.divf %253, %254 : vector<16x1xf32>
    %256 = vector.broadcast %248 : vector<16x1xf32> to vector<16x32xf32>
    %257 = arith.subf %244, %256 : vector<16x32xf32>
    %cst_43 = arith.constant 9.99999974E-6 : f32
    %258 = vector.broadcast %cst_43 : f32 to vector<16x1xf32>
    %259 = arith.addf %255, %258 : vector<16x1xf32>
    %260 = math.rsqrt %259 : vector<16x1xf32>
    %261 = vector.broadcast %260 : vector<16x1xf32> to vector<16x32xf32>
    %262 = arith.mulf %257, %261 : vector<16x32xf32>
    %263 = vector.broadcast %200 : vector<1x32xf32> to vector<16x32xf32>
    %264 = arith.mulf %262, %263 : vector<16x32xf32>
    %265 = vector.broadcast %201 : vector<1x32xf32> to vector<16x32xf32>
    %266 = arith.addf %264, %265 : vector<16x32xf32>
    %cst_44 = arith.constant dense<0.000000e+00> : vector<16x64xf32>
    %267 = tpu.matmul %266, %193, %cst_44 {dimension_numbers = #tpu.dot_dimension_numbers<[1], [0], [0], [1], [0, 0, 1, 1], [], []>} : vector<16x32xf32>, vector<32x64xf32>, vector<16x64xf32> -> vector<16x64xf32>
    %268 = vector.broadcast %198 : vector<1x64xf32> to vector<16x64xf32>
    %269 = arith.addf %267, %268 : vector<16x64xf32>
    %cst_45 = arith.constant 0.000000e+00 : f32
    %270 = vector.broadcast %cst_45 : f32 to vector<16x64xf32>
    %271 = arith.maximumf %269, %270 : vector<16x64xf32>
    %cst_46 = arith.constant dense<0.000000e+00> : vector<16x32xf32>
    %272 = tpu.matmul %271, %194, %cst_46 {dimension_numbers = #tpu.dot_dimension_numbers<[1], [0], [0], [1], [0, 0, 1, 1], [], []>} : vector<16x64xf32>, vector<64x32xf32>, vector<16x32xf32> -> vector<16x32xf32>
    %273 = vector.broadcast %199 : vector<1x32xf32> to vector<16x32xf32>
    %274 = arith.addf %272, %273 : vector<16x32xf32>
    %275 = arith.addf %266, %274 : vector<16x32xf32>
    %cst_47 = arith.constant dense<0.000000e+00> : vector<16xf32>
    %276 = vector.multi_reduction <add>, %275, %cst_47 [1] : vector<16x32xf32> to vector<16xf32>
    %277 = vector.shape_cast %276 : vector<16xf32> to vector<16x1xf32>
    %cst_48 = arith.constant 3.200000e+01 : f32
    %278 = vector.broadcast %cst_48 : f32 to vector<16x1xf32>
    %279 = arith.divf %277, %278 : vector<16x1xf32>
    %280 = vector.broadcast %279 : vector<16x1xf32> to vector<16x32xf32>
    %281 = arith.subf %275, %280 : vector<16x32xf32>
    %282 = arith.mulf %281, %281 : vector<16x32xf32>
    %cst_49 = arith.constant dense<0.000000e+00> : vector<16xf32>
    %283 = vector.multi_reduction <add>, %282, %cst_49 [1] : vector<16x32xf32> to vector<16xf32>
    %284 = vector.shape_cast %283 : vector<16xf32> to vector<16x1xf32>
    %cst_50 = arith.constant 3.200000e+01 : f32
    %285 = vector.broadcast %cst_50 : f32 to vector<16x1xf32>
    %286 = arith.divf %284, %285 : vector<16x1xf32>
    %287 = vector.broadcast %279 : vector<16x1xf32> to vector<16x32xf32>
    %288 = arith.subf %275, %287 : vector<16x32xf32>
    %cst_51 = arith.constant 9.99999974E-6 : f32
    %289 = vector.broadcast %cst_51 : f32 to vector<16x1xf32>
    %290 = arith.addf %286, %289 : vector<16x1xf32>
    %291 = math.rsqrt %290 : vector<16x1xf32>
    %292 = vector.broadcast %291 : vector<16x1xf32> to vector<16x32xf32>
    %293 = arith.mulf %288, %292 : vector<16x32xf32>
    %294 = vector.broadcast %202 : vector<1x32xf32> to vector<16x32xf32>
    %295 = arith.mulf %293, %294 : vector<16x32xf32>
    %296 = vector.broadcast %203 : vector<1x32xf32> to vector<16x32xf32>
    %297 = arith.addf %295, %296 : vector<16x32xf32>
    %c336 = arith.constant 336 : index
    %c0_52 = arith.constant 0 : index
    %298 = vector.load %arg1[%c336, %c0_52] : memref<368x128xf32, #tpu.memory_space<vmem>>, vector<32x16xf32>
    %c16_53 = arith.constant 16 : index
    %c0_54 = arith.constant 0 : index
    %299 = vector.load %arg2[%c16_53, %c0_54] : memref<24x128xf32, #tpu.memory_space<vmem>>, vector<1x16xf32>
    %cst_55 = arith.constant dense<0.000000e+00> : vector<16x16xf32>
    %300 = tpu.matmul %297, %298, %cst_55 {dimension_numbers = #tpu.dot_dimension_numbers<[1], [0], [0], [1], [0, 0, 1, 1], [], []>} : vector<16x32xf32>, vector<32x16xf32>, vector<16x16xf32> -> vector<16x16xf32>
    %301 = vector.broadcast %299 : vector<1x16xf32> to vector<16x16xf32>
    %302 = arith.addf %300, %301 : vector<16x16xf32>
    %c0_56 = arith.constant 0 : index
    %c0_57 = arith.constant 0 : index
    %303 = vector.load %arg3[%c0_56, %c0_57] : memref<16x16xf32, #tpu.memory_space<vmem>>, vector<16x16xf32>
    tpu.vector_store %arg3[%c0_56, %c0_57], %302 {strides = array<i32>} : memref<16x16xf32, #tpu.memory_space<vmem>>, vector<16x16xf32>,
    return
  }
}

</mosaic_0001>

<bundles_post_ra>
// kernel: transformer_forward.1
= control target key start
LH: loop header
LB: loop body
LE: loop exit
PB: predicated region body
PF: predicated region fallthrough
CT: control target
= control target key end

     0   :  { %8 = vsyncpa [#allocation5], 0  ;;  %s5380_s0 = inlined_call_operand.vmem [shape: s32[16], index: 0, kind: input, shape index: {}]   ;;  %s5381_s1 = inlined_call_operand.hbm [shape: f32[368,128], index: 1, kind: input, shape index: {}]   ;;  %s5382_s2 = inlined_call_operand.hbm [shape: f32[24,128], index: 2, kind: input, shape index: {}]   ;;  %s5383_s3 = inlined_call_operand.hbm [shape: f32[16,16], index: 3, kind: output, shape index: {}]  }
   0x1   :  { %9 = vsyncpa [#allocation3], 0 }
   0x2   :  { %10 = vsyncpa [#allocation8], 0 }
   0x3   :  { %11 = vsyncpa [#allocation4], 0  ;;  %s18_s14 = sshll.u32 %s5380_s0, 4  ;;  %s19_s14 = int_to_ptr.vmem [resolvable:$true] %s18_s14 }
   0x4   :  { %s4640_s15 = scalar_lea.vmem %s19_s14, 16  ;;  %p4645_p1 = scmp.lt.s32.totalorder %s19_s14, %s19_s14 }
   0x5   :  { %p4641_p0 = scmp.ne.s32.totalorder %s19_s14, %s4640_s15  ;;  %p4646_p2 = scmp.lt.s32.totalorder %s4640_s15, %s4640_s15 }
   0x7   :  { %p4647_p3 = por %p4646_p2, %p4645_p1 }
   0x9   :  { %p4648_p4 = pnand %p4647_p3, %p4641_p0 }
   0xb   :  { %4651 = shalt.err (!%p4648_p4)
}
   0xc   :  { %s4726_s16 = smov [#allocation2]   ;;  %s4727_s17 = smov [#allocation6]  }
   0xd   :  { %21 = dma.vmem_to_smem %s19_s14, 16, %s4726_s16, [#allocation5]  }
   0xe   :  { %s27_s18 = sshll.u32 %s4727_s17, 4  ;;  %s4652_s21 = scalar_lea.hbm %s5381_s1, 5888  ;;  %s28_s18 = int_to_ptr.vmem [resolvable:$true] %s27_s18 }
   0xf   :  { %p4653_p5 = scmp.ne.s32.totalorder %s5381_s1, %s4652_s21  ;;  %p4656_p6 = scmp.lt.u32.totalorder %s4652_s21, %s5381_s1 }
  0x11   :  { %p4658_p7 = pnand %p4656_p6, %p4653_p5 }
  0x13   :  { %4661 = shalt.err (!%p4658_p7)
}
  0x14   :  { %s4662_s25 = scalar_lea.vmem %s28_s18, 5888  ;;  %p4667_p9 = scmp.lt.s32.totalorder %s28_s18, %s28_s18 }
  0x15   :  { %p4663_p8 = scmp.ne.s32.totalorder %s28_s18, %s4662_s25  ;;  %p4668_p10 = scmp.lt.s32.totalorder %s4662_s25, %s4662_s25 }
  0x17   :  { %p4669_p11 = por %p4668_p10, %p4667_p9 }
  0x19   :  { %p4670_p12 = pnand %p4669_p11, %p4663_p8 }
  0x1b   :  { %4673 = shalt.err (!%p4670_p12)
}
  0x1c   :  { %s4728_s26 = smov 128   ;;  %s4729_s27 = smov 8  }
  0x1d   :  { %33 = dma.hbm_to_vmem [thread:$0]  %s5381_s1, 5888, %s28_s18, [#allocation3], %s4728_s26, %s4728_s26, %s4729_s27  }
  0x1e   :  { %s4730_s30 = smov [#allocation7]   ;;  %s4674_s7 = scalar_lea.hbm %s5382_s2, 384 }
  0x1f   :  { %s39_s4 = sshll.u32 %s4730_s30, 4  ;;  %p4675_p13 = scmp.ne.s32.totalorder %s5382_s2, %s4674_s7  ;;  %s40_s4 = int_to_ptr.vmem [resolvable:$true] %s39_s4 }
  0x20   :  { %p4678_p0 = scmp.lt.u32.totalorder %s4674_s7, %s5382_s2 }
  0x22   :  { %p4680_p1 = pnand %p4678_p0, %p4675_p13 }
  0x24   :  { %4683 = shalt.err (!%p4680_p1)
}
  0x25   :  { %s4684_s12 = scalar_lea.vmem %s40_s4, 384  ;;  %p4689_p3 = scmp.lt.s32.totalorder %s40_s4, %s40_s4 }
  0x26   :  { %p4685_p2 = scmp.ne.s32.totalorder %s40_s4, %s4684_s12  ;;  %p4690_p4 = scmp.lt.s32.totalorder %s4684_s12, %s4684_s12 }
  0x28   :  { %p4691_p5 = por %p4690_p4, %p4689_p3 }
  0x2a   :  { %p4692_p6 = pnand %p4691_p5, %p4685_p2 }
  0x2c   :  { %4695 = shalt.err (!%p4692_p6)
}
  0x2d   :  { %45 = dma.hbm_to_vmem [thread:$0]  %s5382_s2, 384, %s40_s4, [#allocation8], %s4728_s26, %s4728_s26, %s4729_s27  }
  0x2e   :  { %4718 = dma.done.wait [#allocation5], 16  }
  0x2f   :  { %4719 = vsyncadd [#allocation5], 4294967280 }
  0x30   :  { %4720 = dma.done.wait [#allocation3], 5888  }
  0x31   :  { %4721 = vsyncadd [#allocation3], 4294961408 }
  0x32   :  { %4722 = dma.done.wait [#allocation8], 384  }
  0x33   :  { %4723 = vsyncadd [#allocation8], 4294966912 }
  0x34   :  { %55 = sfence }
  0x35   :  { %v159_v0 = vld [vmem:[#allocation6] sm:$0xff]  ;;  %v160_v1 = vld [vmem:[#allocation6 + $0x8] sm:$0xff]  ;;  %v56_v2 = vlaneseq  ;;  %s58_s14 = sld [smem:[#allocation2]]  ;;  %s4794_s15 = sld [smem:[#allocation2 + $0x1]]  ;;  %vm138_vm0 = vcmask 1040384   ;;  %vm140_vm1 = vcmask 1041408  }
  0x36   :  { %v4453_v3 = vpack.c.bf16 %v160_v1, %v159_v0  ;;  %s4796_s16 = sld [smem:[#allocation2 + $0x2]]  ;;  %s4798_s17 = sld [smem:[#allocation2 + $0x3]]  ;;  %vm142_vm2 = vcmask 1042432   ;;  %vm144_vm3 = vcmask 1043456   ;;  %v243_v5 = vld [vmem:[#allocation6 + $0x10] sm:$0xff]  ;;  %v244_v6 = vld [vmem:[#allocation6 + $0x18] sm:$0xff] }
  0x37   :  { %s4800_s18 = sld [smem:[#allocation2 + $0x4]]  ;;  %v4803_v4 = vand.u32 127, %v56_v2  ;;  %s4805_s2 = sld [smem:[#allocation2 + $0x5]]  ;;  %v4731_v7 = vmov 0.0   ;;  %vm146_vm4 = vcmask 1044480   ;;  %vm148_vm5 = vcmask 1045504  }
  0x38   :  { %4454 = vmatprep.subr.bf16.mxu0 %v4453_v3  ;;  %s4807_s19 = sld [smem:[#allocation2 + $0x6]]  ;;  %s4809_s20 = sld [smem:[#allocation2 + $0x7]]  ;;  %v4457_v9 = vpack.c.bf16 %v244_v6, %v243_v5  ;;  %v245_v10 = vld [vmem:[#allocation6 + $0x20] sm:$0xff]  ;;  %v246_v11 = vld [vmem:[#allocation6 + $0x28] sm:$0xff]  ;;  %vm150_vm7 = vcmask 1046528   ;;  %vm161_vm10 = vcmask 130048  }
  0x39   :  { %4456 = vmatpush3.bf16.msra.mxu0 %v4453_v3  ;;  %s4811_s21 = sld [smem:[#allocation2 + $0x8]]  ;;  %s4813_s22 = sld [smem:[#allocation2 + $0x9]]  ;;  %v4461_v14 = vpack.c.bf16 %v246_v11, %v245_v10  ;;  %v4901_v60 = vshrl.u32 %v56_v2, 7  ;;  %v4904_v62 = vld [vmem:[#allocation7] sm:$0xff] }
  0x3a   :  { %4189 = vmatprep.subr.mxu0 %v4731_v7  ;;  %s4816_s23 = sld [smem:[#allocation2 + $0xa]]  ;;  %s4825_s0 = sld [smem:[#allocation2 + $0xb]]  ;;  %4458 = vmatprep.subr.bf16.mxu1 %v4457_v9 }
  0x3b   :  { %v59_v8 = vstv %s58_s14  ;;  %v64_v12 = vstv %s4794_s15  ;;  %s4827_s24 = sld [smem:[#allocation2 + $0xc]]  ;;  %s4833_s25 = sld [smem:[#allocation2 + $0xd]]  ;;  %4460 = vmatpush3.bf16.msra.mxu1 %v4457_v9  ;;  %v266_v61 = vsub.s32 0, %v4901_v60 }
  0x3c   :  { %vm60_vm6 = vcmp.eq.s32.totalorder %v4803_v4, %v59_v8  ;;  %v69_v13 = vstv %s4796_s16  ;;  %vm65_vm8 = vcmp.eq.s32.totalorder %v4803_v4, %v64_v12  ;;  %v74_v16 = vstv %s4798_s17  ;;  %4462 = vmatprep.subr.bf16.mxu1 %v4461_v14  ;;  %s4843_s28 = sld [smem:[#allocation2 + $0xe]]  ;;  %s4845_s29 = sld [smem:[#allocation2 + $0xf]] }
  0x3d   :  { %v3941_v15 = vsel %vm60_vm6, 1.0, %v4731_v7  ;;  %vm70_vm9 = vcmp.eq.s32.totalorder %v4803_v4, %v69_v13  ;;  %v3943_v17 = vsel %vm65_vm8, 1.0, %v4731_v7  ;;  %vm75_vm11 = vcmp.eq.s32.totalorder %v4803_v4, %v74_v16  ;;  %s4732_s30 = smov 112   ;;  %s4733_s4 = smov 120  }
  0x3e   :  { %v3945_v18 = vsel %vm70_vm9, 1.0, %v4731_v7  ;;  %v79_v19 = vstv %s4800_s18  ;;  %v3947_v20 = vsel %vm75_vm11, 1.0, %v4731_v7  ;;  %v84_v21 = vstv %s4805_s2  ;;  %s4735_s5 = smov 104   ;;  %s4736_s6 = smov 96  }
  0x3f   :  { %vm80_vm12 = vcmp.eq.s32.totalorder %v4803_v4, %v79_v19  ;;  %v89_v22 = vstv %s4807_s19  ;;  %vm85_vm13 = vcmp.eq.s32.totalorder %v4803_v4, %v84_v21  ;;  %v94_v24 = vstv %s4809_s20  ;;  %4464 = vmatpush3.bf16.msra.mxu1 %v4461_v14  ;;  %s4737_s7 = smov 64   ;;  %s4738_s8 = smov 16  }
  0x40   :  { %v3949_v23 = vsel %vm80_vm12, 1.0, %v4731_v7  ;;  %vm90_vm14 = vcmp.eq.s32.totalorder %v4803_v4, %v89_v22  ;;  %v3951_v25 = vsel %vm85_vm13, 1.0, %v4731_v7  ;;  %vm95_vm15 = vcmp.eq.s32.totalorder %v4803_v4, %v94_v24  ;;  %4199 = vmatprep.subr.mxu1 %v4731_v7  ;;  %s4739_s9 = smov 24   ;;  %s4740_s10 = smov [#allocation9]  }
  0x41   :  { %v3953_v26 = vsel %vm90_vm14, 1.0, %v4731_v7  ;;  %v139_v27 = vsel %vm138_vm0, %v3941_v15, %v3943_v17  ;;  %v3955_v28 = vsel %vm95_vm15, 1.0, %v4731_v7  ;;  %v99_v30 = vstv %s4811_s21  ;;  %s3927_s11 = sshll.u32 %s4740_s10, 4  ;;  %s3928_s11 = int_to_ptr.vmem [resolvable:$true] %s3927_s11 }
  0x42   :  { %v141_v29 = vsel %vm140_vm1, %v139_v27, %v3945_v18  ;;  %v104_v31 = vstv %s4813_s22  ;;  %vm100_vm6 = vcmp.eq.s32.totalorder %v4803_v4, %v99_v30  ;;  %v109_v33 = vstv %s4816_s23  ;;  %s4696_s12 = scalar_lea.vmem %s3928_s11, 256  ;;  %p4701_p8 = scmp.lt.s32.totalorder %s3928_s11, %s3928_s11 }
  0x43   :  { %v143_v32 = vsel %vm142_vm2, %v141_v29, %v3947_v20  ;;  %vm105_vm8 = vcmp.eq.s32.totalorder %v4803_v4, %v104_v31  ;;  %v3957_v35 = vsel %vm100_vm6, 1.0, %v4731_v7  ;;  %vm110_vm9 = vcmp.eq.s32.totalorder %v4803_v4, %v109_v33  ;;  %p4697_p7 = scmp.ne.s32.totalorder %s3928_s11, %s4696_s12  ;;  %p4702_p9 = scmp.lt.s32.totalorder %s4696_s12, %s4696_s12 }
  0x44   :  { %v145_v34 = vsel %vm144_vm3, %v143_v32, %v3949_v23  ;;  %v3959_v36 = vsel %vm105_vm8, 1.0, %v4731_v7  ;;  %v3961_v38 = vsel %vm110_vm9, 1.0, %v4731_v7  ;;  %v114_v39 = vstv %s4825_s0 }
  0x45   :  { %v147_v37 = vsel %vm146_vm4, %v145_v34, %v3951_v25  ;;  %v119_v40 = vstv %s4827_s24  ;;  %vm115_vm11 = vcmp.eq.s32.totalorder %v4803_v4, %v114_v39  ;;  %v124_v42 = vstv %s4833_s25  ;;  %p4703_p10 = por %p4702_p9, %p4701_p8 }
  0x46   :  { %v149_v41 = vsel %vm148_vm5, %v147_v37, %v3953_v26  ;;  %vm120_vm12 = vcmp.eq.s32.totalorder %v4803_v4, %v119_v40  ;;  %v3963_v44 = vsel %vm115_vm11, 1.0, %v4731_v7  ;;  %vm125_vm13 = vcmp.eq.s32.totalorder %v4803_v4, %v124_v42 }
  0x47   :  { %v151_v43 = vsel %vm150_vm7, %v149_v41, %v3955_v28  ;;  %v3965_v45 = vsel %vm120_vm12, 1.0, %v4731_v7  ;;  %v129_v46 = vstv %s4843_s28  ;;  %v134_v47 = vstv %s4845_s29  ;;  %p4704_p11 = pnand %p4703_p10, %p4697_p7 }
  0x48   :  { %4175 = vmatprep.mubr.msk.f32.mxu0 %vm161_vm10, %v151_v43  ;;  %v152_v48 = vsel %vm138_vm0, %v3957_v35, %v3959_v36  ;;  %v3967_v49 = vsel %vm125_vm13, 1.0, %v4731_v7  ;;  %vm130_vm14 = vcmp.eq.s32.totalorder %v4803_v4, %v129_v46  ;;  %vm135_vm15 = vcmp.eq.s32.totalorder %v4803_v4, %v134_v47 }
  0x49   :  { %v153_v50 = vsel %vm140_vm1, %v152_v48, %v3961_v38  ;;  %v3969_v51 = vsel %vm130_vm14, 1.0, %v4731_v7  ;;  %v3971_v53 = vsel %vm135_vm15, 1.0, %v4731_v7  ;;  %vm268_vm0 = vcmask 261120  }
  0x4a   :  { %v154_v52 = vsel %vm142_vm2, %v153_v50, %v3963_v44  ;;  %v267_v63 = vrot.slane %v4904_v62, %v266_v61  ;;  %vm4734_vm1 = vmmov 0   ;;  %vm366_vm2 = vcmask 64512  }
  0x4b   :  { %v155_v54 = vsel %vm144_vm3, %v154_v52, %v3965_v45  ;;  %vm1697_vm3 = vcmask 195584  }
  0x4c   :  { %v156_v55 = vsel %vm146_vm4, %v155_v54, %v3967_v49  ;;  %vm1917_vm4 = vcmask 523264  }
  0x4d   :  { %v157_v56 = vsel %vm148_vm5, %v156_v55, %v3969_v51 }
  0x4e   :  { %v158_v57 = vsel %vm150_vm7, %v157_v56, %v3971_v53 }
  0x4f   :  { %4176 = vmatmul.mubr.msk.f32.vlgmr.msra.gmra.mrb[0].mxu0 %vm161_vm10, %v158_v57 }
  0x50   :  { %4191 = vmatprep.mubr.msk.f32.mxu0 %vm4734_vm1, %v4731_v7 }
 0x122   :  { %v4892_v58 = vpop.f32.mrb[0].mxu0 }
 0x123   :  { %v4894_v59 = vpop.f32.mrb[1].mxu0 }
 0x124   :  { %4186 = vmatprep.mubr.msk.f32.mxu1 %vm268_vm0, %v4894_v59 }
 0x125   :  { %4187 = vmatmul.mubr.msk.f32.vlgmr.msra.gmra.mrb[0].mxu1 %vm268_vm0, %v4892_v58 }
 0x126   :  { %4201 = vmatprep.mubr.msk.f32.mxu1 %vm4734_vm1, %v4731_v7 }
 0x1f8   :  { %v4188_v0 = vpop.f32.mrb[0].mxu1 }
 0x1f9   :  { %v341_v1 = vpop.f32.mrb[1].mxu1  ;;  %v4919_v2 = vadd.f32 %v4188_v0, %v267_v63 }
 0x1fa   :  { %v4909_v3 = vadd.f32 %v341_v1, %v267_v63 }
 0x1fc   :  { %356 = vrot.lane.b32.xlu1 %v4909_v3, %s4732_s30  ;;  %352 = vrot.lane.b32.xlu0 %v4909_v3, %s4733_s4 }
 0x200   :  { %358 = vrot.lane.b32.xlu1 %v4919_v2, %s4732_s30  ;;  %354 = vrot.lane.b32.xlu0 %v4919_v2, %s4733_s4 }
 0x204   :  { %362 = vrot.lane.b32.xlu1 %v4919_v2, %s4735_s5  ;;  %360 = vrot.lane.b32.xlu0 %v4909_v3, %s4735_s5 }
 0x208   :  { %441 = vrot.lane.b32.xlu1 %v4919_v2, %s4736_s6  ;;  %364 = vrot.lane.b32.xlu0 %v4909_v3, %s4736_s6 }
 0x26e   :  { %v4933_v4 = vpop.permute.xlu1 %356  ;;  %v4935_v5 = vpop.permute.xlu0 %352 }
 0x26f   :  { %517 = vrot.lane.b32.xlu0 %v4935_v5, %s4736_s6 }
 0x272   :  { %v4939_v6 = vpop.permute.xlu1 %358  ;;  %v4941_v8 = vpop.permute.xlu0 %354 }
 0x273   :  { %669 = vrot.lane.b32.xlu0 %v4933_v4, %s4736_s6  ;;  %593 = vrot.lane.b32.xlu1 %v4941_v8, %s4736_s6 }
 0x276   :  { %v4947_v9 = vpop.permute.xlu0 %360  ;;  %v4953_v10 = vpop.permute.xlu1 %362 }
 0x277   :  { %745 = vrot.lane.b32.xlu1 %v4939_v6, %s4736_s6  ;;  %821 = vrot.lane.b32.xlu0 %v4947_v9, %s4736_s6 }
 0x27a   :  { %v365_v11 = vpop.permute.xlu0 %364  ;;  %v442_v12 = vpop.permute.xlu1 %441 }
 0x27b   :  { %897 = vrot.lane.b32.xlu1 %v4953_v10, %s4736_s6  ;;  %4190 = vmatpush3.xpose.msk.msra.mxu0 %vm366_vm2, %v365_v11 }
 0x27c   :  { %4194 = vmatprep.subr.mxu0 %v4731_v7 }
 0x27e   :  { %4192 = vmatmul.mubr.msk.f32.vlgmr.msra.gmra.mrb[2].mxu0 %vm366_vm2, %v4909_v3 }
 0x27f   :  { %4195 = vmatpush3.xpose.msk.msra.mxu0 %vm366_vm2, %v442_v12  ;;  %4196 = vmatprep.mubr.msk.f32.mxu0 %vm4734_vm1, %v4731_v7 }
 0x280   :  { %4204 = vmatprep.subr.mxu0 %v4731_v7 }
 0x282   :  { %4197 = vmatmul.mubr.msk.f32.vlgmr.msra.gmra.mrb[4].mxu0 %vm366_vm2, %v4919_v2 }
 0x283   :  { %4206 = vmatprep.mubr.msk.f32.mxu0 %vm4734_vm1, %v4731_v7 }
 0x2e1   :  { %v518_v13 = vpop.permute.xlu0 %517 }
 0x2e2   :  { %4200 = vmatpush3.xpose.msk.msra.mxu1 %vm366_vm2, %v518_v13 }
 0x2e3   :  { %4209 = vmatprep.subr.mxu1 %v4731_v7 }
 0x2e5   :  { %v594_v14 = vpop.permute.xlu1 %593  ;;  %4202 = vmatmul.mubr.msk.f32.vlgmr.msra.gmra.mrb[2].mxu1 %vm366_vm2, %v4935_v5  ;;  %v670_v15 = vpop.permute.xlu0 %669 }
 0x2e6   :  { %4205 = vmatpush3.xpose.msk.msra.mxu0 %vm366_vm2, %v594_v14  ;;  %4210 = vmatpush3.xpose.msk.msra.mxu1 %vm366_vm2, %v670_v15 }
 0x2e7   :  { %4211 = vmatprep.mubr.msk.f32.mxu1 %vm4734_vm1, %v4731_v7  ;;  %4214 = vmatprep.subr.mxu0 %v4731_v7 }
 0x2e8   :  { %4219 = vmatprep.subr.mxu1 %v4731_v7 }
 0x2e9   :  { %v746_v16 = vpop.permute.xlu1 %745  ;;  %4207 = vmatmul.mubr.msk.f32.vlgmr.msra.gmra.mrb[6].mxu0 %vm366_vm2, %v4941_v8  ;;  %4212 = vmatmul.mubr.msk.f32.vlgmr.msra.gmra.mrb[4].mxu1 %vm366_vm2, %v4933_v4  ;;  %v822_v17 = vpop.permute.xlu0 %821 }
 0x2ea   :  { %4215 = vmatpush3.xpose.msk.msra.mxu0 %vm366_vm2, %v746_v16  ;;  %4220 = vmatpush3.xpose.msk.msra.mxu1 %vm366_vm2, %v822_v17 }
 0x2eb   :  { %4216 = vmatprep.mubr.msk.f32.mxu0 %vm4734_vm1, %v4731_v7  ;;  %4221 = vmatprep.mubr.msk.f32.mxu1 %vm4734_vm1, %v4731_v7 }
 0x2ec   :  { %4224 = vmatprep.subr.mxu0 %v4731_v7  ;;  %4229 = vmatprep.subr.mxu1 %v4731_v7 }
 0x2ed   :  { %v898_v18 = vpop.permute.xlu1 %897  ;;  %4217 = vmatmul.mubr.msk.f32.vlgmr.msra.gmra.mrb[8].mxu0 %vm366_vm2, %v4939_v6  ;;  %4222 = vmatmul.mubr.msk.f32.vlgmr.msra.gmra.mrb[6].mxu1 %vm366_vm2, %v4947_v9 }
 0x2ee   :  { %4225 = vmatpush3.xpose.msk.msra.mxu0 %vm366_vm2, %v898_v18  ;;  %4226 = vmatprep.mubr.msk.f32.mxu0 %vm4734_vm1, %v4731_v7 }
 0x2ef   :  { %4234 = vmatprep.subr.mxu0 %v4731_v7  ;;  %4231 = vmatprep.mubr.msk.f32.mxu1 %vm4734_vm1, %v4731_v7 }
 0x2f1   :  { %4227 = vmatmul.mubr.msk.f32.vlgmr.msra.gmra.mrb[10].mxu0 %vm366_vm2, %v4953_v10 }
 0x2f2   :  { %4236 = vmatprep.mubr.msk.f32.mxu0 %vm4734_vm1, %v4731_v7 }
 0x351   :  { %v437_v19 = vpop.f32.mrb[2].mxu0 }
 0x352   :  { %v4193_v20 = vpop.f32.mrb[3].mxu0  ;;  %v973_v21 = vsel %vm366_vm2, %v437_v19, -inf }
 0x353   :  { %974 = vmax.xlane.f32.xlu0 %v973_v21 }
 0x355   :  { %v513_v22 = vpop.f32.mrb[4].mxu0 }
 0x356   :  { %v4198_v23 = vpop.f32.mrb[5].mxu0  ;;  %v976_v24 = vsel %vm366_vm2, %v513_v22, -inf }
 0x357   :  { %977 = vmax.xlane.f32.xlu1 %v976_v24 }
 0x3b8   :  { %v589_v25 = vpop.f32.mrb[2].mxu1 }
 0x3b9   :  { %v4203_v26 = vpop.f32.mrb[3].mxu1  ;;  %v979_v27 = vsel %vm366_vm2, %v589_v25, -inf }
 0x3ba   :  { %980 = vmax.xlane.f32.xlu0 %v979_v27 }
 0x3bc   :  { %v665_v28 = vpop.f32.mrb[6].mxu0  ;;  %v741_v29 = vpop.f32.mrb[4].mxu1 }
 0x3bd   :  { %v4208_v30 = vpop.f32.mrb[7].mxu0  ;;  %v4213_v31 = vpop.f32.mrb[5].mxu1  ;;  %v982_v32 = vsel %vm366_vm2, %v665_v28, -inf  ;;  %v985_v33 = vsel %vm366_vm2, %v741_v29, -inf }
 0x3be   :  { %983 = vmax.xlane.f32.xlu0 %v982_v32  ;;  %986 = vmax.xlane.f32.xlu1 %v985_v33 }
 0x3c0   :  { %v817_v34 = vpop.f32.mrb[8].mxu0  ;;  %v893_v35 = vpop.f32.mrb[6].mxu1 }
 0x3c1   :  { %v4218_v36 = vpop.f32.mrb[9].mxu0  ;;  %v4223_v37 = vpop.f32.mrb[7].mxu1  ;;  %v988_v38 = vsel %vm366_vm2, %v817_v34, -inf  ;;  %v991_v39 = vsel %vm366_vm2, %v893_v35, -inf }
 0x3c2   :  { %989 = vmax.xlane.f32.xlu0 %v988_v38  ;;  %992 = vmax.xlane.f32.xlu1 %v991_v39 }
 0x3c4   :  { %v969_v40 = vpop.f32.mrb[10].mxu0 }
 0x3c5   :  { %v4228_v41 = vpop.f32.mrb[11].mxu0  ;;  %v994_v42 = vsel %vm366_vm2, %v969_v40, -inf }
 0x3c6   :  { %995 = vmax.xlane.f32.xlu0 %v994_v42 }
 0x3d3   :  { %1061 = vrot.lane.b32.xlu1 %v4909_v3, %s4737_s7 }
 0x3d7   :  { %1213 = vrot.lane.b32.xlu1 %v4935_v5, %s4737_s7 }
 0x3db   :  { %1289 = vrot.lane.b32.xlu1 %v4941_v8, %s4737_s7 }
 0x3dc   :  { %1137 = vrot.lane.b32.xlu0 %v4919_v2, %s4737_s7 }
 0x3df   :  { %1441 = vrot.lane.b32.xlu1 %v4939_v6, %s4737_s7 }
 0x3e0   :  { %1365 = vrot.lane.b32.xlu0 %v4933_v4, %s4737_s7  ;;  %v975_v45 = vpop.xlane.xlu0 %974 }
 0x3e1   :  { %v997_v46 = vsub.f32 %v437_v19, %v975_v45 }
 0x3e3   :  { %v1005_v48 = vmul.f32 1.442695, %v997_v46 }
 0x3e4   :  { %v978_v43 = vpop.xlane.xlu1 %977 }
 0x3e5   :  { %v998_v44 = vsub.f32 %v513_v22, %v978_v43 }
 0x3e7   :  { %v1007_v47 = vmul.f32 1.442695, %v998_v44 }
 0x3e9   :  { %4560 = vpow2.f32 %v1007_v47 }
 0x3ea   :  { %4562 = vpow2.f32 %v1005_v48 }
 0x3f3   :  { %v5025_v49 = vpop.eup %4560 }
 0x3f4   :  { %v1024_v50 = vsel %vm366_vm2, %v5025_v49, 0.0  ;;  %v5029_v51 = vpop.eup %4562 }
 0x3f5   :  { %v1021_v52 = vsel %vm366_vm2, %v5029_v51, 0.0 }
 0x3ff   :  { %1025 = vadd.xlane.f32.xlu0 %v1024_v50 }
 0x403   :  { %1022 = vadd.xlane.f32.xlu1 %v1021_v52 }
 0x447   :  { %v981_v53 = vpop.xlane.xlu0 %980 }
 0x448   :  { %v999_v54 = vsub.f32 %v589_v25, %v981_v53 }
 0x44a   :  { %v1009_v55 = vmul.f32 1.442695, %v999_v54 }
 0x44b   :  { %v987_v56 = vpop.xlane.xlu1 %986  ;;  %v984_v57 = vpop.xlane.xlu0 %983 }
 0x44c   :  { %4564 = vpow2.f32 %v1009_v55  ;;  %v1001_v63 = vsub.f32 %v741_v29, %v987_v56  ;;  %v1000_v0 = vsub.f32 %v665_v28, %v984_v57 }
 0x44e   :  { %v1013_v1 = vmul.f32 1.442695, %v1001_v63  ;;  %v1011_v3 = vmul.f32 1.442695, %v1000_v0 }
 0x44f   :  { %v993_v2 = vpop.xlane.xlu1 %992  ;;  %v990_v4 = vpop.xlane.xlu0 %989 }
 0x450   :  { %4566 = vpow2.f32 %v1013_v1  ;;  %v1003_v5 = vsub.f32 %v893_v35, %v993_v2  ;;  %v1002_v6 = vsub.f32 %v817_v34, %v990_v4  ;;  %v248_v2 = vld [vmem:[#allocation6 + $0x38] sm:$0xff] }
 0x451   :  { %4568 = vpow2.f32 %v1011_v3  ;;  %v247_v3 = vld [vmem:[#allocation6 + $0x30] sm:$0xff] }
 0x452   :  { %v1017_v8 = vmul.f32 1.442695, %v1003_v5  ;;  %v1015_v11 = vmul.f32 1.442695, %v1002_v6  ;;  %v4465_v4 = vpack.c.bf16 %v248_v2, %v247_v3  ;;  %v249_v5 = vld [vmem:[#allocation6 + $0x40] sm:$0xff]  ;;  %v250_v6 = vld [vmem:[#allocation6 + $0x48] sm:$0xff] }
 0x453   :  { %v1062_v12 = vpop.permute.xlu1 %1061  ;;  %v996_v13 = vpop.xlane.xlu0 %995  ;;  %v258_v3 = vld [vmem:[#allocation6 + $0x88] sm:$0xff] }
 0x454   :  { %4570 = vpow2.f32 %v1017_v8  ;;  %v1004_v14 = vsub.f32 %v969_v40, %v996_v13  ;;  %4230 = vmatpush3.msra.mxu1 %v1062_v12  ;;  %v4469_v8 = vpack.c.bf16 %v250_v6, %v249_v5  ;;  %v260_v5 = vld [vmem:[#allocation6 + $0x98] sm:$0xff] }
 0x455   :  { %4572 = vpow2.f32 %v1015_v11  ;;  %4239 = vmatprep.subr.mxu1 %v4731_v7 }
 0x456   :  { %v4565_v15 = vpop.eup %4564  ;;  %v1019_v16 = vmul.f32 1.442695, %v1004_v14 }
 0x457   :  { %v1138_v17 = vpop.permute.xlu0 %1137  ;;  %v1027_v18 = vsel %vm366_vm2, %v4565_v15, 0.0  ;;  %v1214_v29 = vpop.permute.xlu1 %1213 }
 0x458   :  { %4574 = vpow2.f32 %v1019_v16  ;;  %1028 = vadd.xlane.f32.xlu1 %v1027_v18  ;;  %4235 = vmatpush3.msra.mxu0 %v1138_v17 }
 0x459   :  { %4244 = vmatprep.subr.mxu0 %v4731_v7 }
 0x45a   :  { %v4567_v19 = vpop.eup %4566 }
 0x45b   :  { %v4569_v20 = vpop.eup %4568  ;;  %v1033_v21 = vsel %vm366_vm2, %v4567_v19, 0.0  ;;  %v1290_v30 = vpop.permute.xlu1 %1289 }
 0x45c   :  { %1034 = vadd.xlane.f32.xlu1 %v1033_v21  ;;  %v1030_v22 = vsel %vm366_vm2, %v4569_v20, 0.0  ;;  %v1366_v31 = vpop.permute.xlu0 %1365 }
 0x45d   :  { %1031 = vadd.xlane.f32.xlu0 %v1030_v22 }
 0x45e   :  { %v4571_v23 = vpop.eup %4570 }
 0x45f   :  { %v4573_v24 = vpop.eup %4572  ;;  %v1039_v25 = vsel %vm366_vm2, %v4571_v23, 0.0  ;;  %v1442_v32 = vpop.permute.xlu1 %1441 }
 0x460   :  { %1040 = vadd.xlane.f32.xlu1 %v1039_v25  ;;  %v1036_v26 = vsel %vm366_vm2, %v4573_v24, 0.0 }
 0x461   :  { %1037 = vadd.xlane.f32.xlu0 %v1036_v26 }
 0x462   :  { %v5040_v27 = vpop.eup %4574 }
 0x463   :  { %v1042_v28 = vsel %vm366_vm2, %v5040_v27, 0.0 }
 0x465   :  { %1043 = vadd.xlane.f32.xlu0 %v1042_v28 }
 0x471   :  { %1593 = vrot.lane.b32.xlu1 %v4953_v10, %s4737_s7 }
 0x47b   :  { %1517 = vrot.lane.b32.xlu0 %v4947_v9, %s4737_s7 }
 0x48c   :  { %v1026_v33 = vpop.xlane.xlu0 %1025 }
 0x48d   :  { %4576 = vrcp.f32 %v1026_v33 }
 0x490   :  { %v1023_v34 = vpop.xlane.xlu1 %1022 }
 0x491   :  { %4578 = vrcp.f32 %v1023_v34 }
 0x497   :  { %v4577_v35 = vpop.eup %4576 }
 0x498   :  { %v1054_v36 = vmul.f32 %v4577_v35, %v5025_v49  ;;  %v1702_v35 = vsub.s32 1, %v4901_v60 }
 0x49a   :  { %4237 = vmatmul.mubr.msk.f32.vlgmr.msra.gmra.mrb[12].mxu0 %vm366_vm2, %v1054_v36  ;;  %v1703_v36 = vrot.slane %v4904_v62, %v1702_v35 }
 0x49b   :  { %v4579_v37 = vpop.eup %4578  ;;  %4245 = vmatpush3.msra.mxu0 %v1290_v30  ;;  %4246 = vmatprep.mubr.msk.f32.mxu0 %vm4734_vm1, %v4731_v7 }
 0x49c   :  { %v1053_v9 = vmul.f32 %v4579_v37, %v5029_v51  ;;  %4254 = vmatprep.subr.mxu0 %v4731_v7 }
 0x49e   :  { %4232 = vmatmul.mubr.msk.f32.vlgmr.msra.gmra.mrb[8].mxu1 %vm366_vm2, %v1053_v9 }
 0x49f   :  { %4240 = vmatpush3.msra.mxu1 %v1214_v29  ;;  %4241 = vmatprep.mubr.msk.f32.mxu1 %vm4734_vm1, %v4731_v7 }
 0x4a0   :  { %4249 = vmatprep.subr.mxu1 %v4731_v7 }
 0x4e5   :  { %v1029_v10 = vpop.xlane.xlu1 %1028 }
 0x4e6   :  { %4580 = vrcp.f32 %v1029_v10 }
 0x4e9   :  { %v1035_v38 = vpop.xlane.xlu1 %1034 }
 0x4ea   :  { %4582 = vrcp.f32 %v1035_v38  ;;  %v1032_v39 = vpop.xlane.xlu0 %1031 }
 0x4eb   :  { %4584 = vrcp.f32 %v1032_v39 }
 0x4ed   :  { %v1041_v40 = vpop.xlane.xlu1 %1040 }
 0x4ee   :  { %4586 = vrcp.f32 %v1041_v40  ;;  %v1038_v41 = vpop.xlane.xlu0 %1037 }
 0x4ef   :  { %4588 = vrcp.f32 %v1038_v41 }
 0x4f0   :  { %v4581_v42 = vpop.eup %4580 }
 0x4f1   :  { %v1055_v43 = vmul.f32 %v4581_v42, %v4565_v15  ;;  %v1594_v54 = vpop.permute.xlu1 %1593 }
 0x4f2   :  { %v1044_v44 = vpop.xlane.xlu0 %1043 }
 0x4f3   :  { %4590 = vrcp.f32 %v1044_v44  ;;  %4242 = vmatmul.mubr.msk.f32.vlgmr.msra.gmra.mrb[10].mxu1 %vm366_vm2, %v1055_v43 }
 0x4f4   :  { %v4583_v45 = vpop.eup %4582  ;;  %4250 = vmatpush3.msra.mxu1 %v1366_v31  ;;  %4251 = vmatprep.mubr.msk.f32.mxu1 %vm4734_vm1, %v4731_v7 }
 0x4f5   :  { %v4585_v46 = vpop.eup %4584  ;;  %v1057_v47 = vmul.f32 %v4583_v45, %v4567_v19  ;;  %4259 = vmatprep.subr.mxu1 %v4731_v7 }
 0x4f6   :  { %v1056_v48 = vmul.f32 %v4585_v46, %v4569_v20  ;;  %v1518_v49 = vpop.permute.xlu0 %1517 }
 0x4f7   :  { %4252 = vmatmul.mubr.msk.f32.vlgmr.msra.gmra.mrb[12].mxu1 %vm366_vm2, %v1057_v47 }
 0x4f8   :  { %v4587_v50 = vpop.eup %4586  ;;  %4247 = vmatmul.mubr.msk.f32.vlgmr.msra.gmra.mrb[14].mxu0 %vm366_vm2, %v1056_v48  ;;  %4260 = vmatpush3.msra.mxu1 %v1518_v49 }
 0x4f9   :  { %v4589_v51 = vpop.eup %4588  ;;  %v1059_v52 = vmul.f32 %v4587_v50, %v4571_v23  ;;  %4255 = vmatpush3.msra.mxu0 %v1442_v32  ;;  %4256 = vmatprep.mubr.msk.f32.mxu0 %vm4734_vm1, %v4731_v7 }
 0x4fa   :  { %v1058_v53 = vmul.f32 %v4589_v51, %v4573_v24  ;;  %4261 = vmatprep.mubr.msk.f32.mxu1 %vm4734_vm1, %v4731_v7  ;;  %4264 = vmatprep.subr.mxu0 %v4731_v7 }
 0x4fb   :  { %4262 = vmatmul.mubr.msk.f32.vlgmr.msra.gmra.mrb[14].mxu1 %vm366_vm2, %v1059_v52  ;;  %4466 = vmatprep.subr.bf16.mxu1 %v4465_v4  ;;  %v252_v52 = vld [vmem:[#allocation6 + $0x58] sm:$0xff] }
 0x4fc   :  { %4257 = vmatmul.mubr.msk.f32.vlgmr.msra.gmra.mrb[16].mxu0 %vm366_vm2, %v1058_v53  ;;  %4468 = vmatpush3.bf16.msra.mxu1 %v4465_v4  ;;  %v259_v4 = vld [vmem:[#allocation6 + $0x90] sm:$0xff] }
 0x4fd   :  { %v4591_v55 = vpop.eup %4590  ;;  %4265 = vmatpush3.msra.mxu0 %v1594_v54  ;;  %4266 = vmatprep.mubr.msk.f32.mxu0 %vm4734_vm1, %v4731_v7  ;;  %v253_v54 = vld [vmem:[#allocation6 + $0x60] sm:$0xff]  ;;  %v4489_v6 = vpack.c.bf16 %v260_v5, %v259_v4 }
 0x4fe   :  { %v1060_v56 = vmul.f32 %v4591_v55, %v5040_v27  ;;  %4470 = vmatprep.subr.bf16.mxu1 %v4469_v8  ;;  %v254_v55 = vld [vmem:[#allocation6 + $0x68] sm:$0xff] }
 0x500   :  { %4267 = vmatmul.mubr.msk.f32.vlgmr.msra.gmra.mrb[18].mxu0 %vm366_vm2, %v1060_v56  ;;  %4472 = vmatpush3.bf16.msra.mxu1 %v4469_v8  ;;  %v4477_v56 = vpack.c.bf16 %v254_v55, %v253_v54 }
 0x56d   :  { %v1209_v57 = vpop.f32.mrb[12].mxu0 }
 0x56e   :  { %v4238_v63 = vpop.f32.mrb[13].mxu0 }
 0x56f   :  { %v256_v63 = vld [vmem:[#allocation6 + $0x78] sm:$0xff] }
 0x571   :  { %v1133_v0 = vpop.f32.mrb[8].mxu1 }
 0x572   :  { %v4233_v1 = vpop.f32.mrb[9].mxu1 }
 0x5c6   :  { %v1285_v11 = vpop.f32.mrb[10].mxu1 }
 0x5c7   :  { %v4243_v12 = vpop.f32.mrb[11].mxu1  ;;  %1671 = vrot.lane.b32.xlu0 %v1285_v11, %s4729_s27 }
 0x5ca   :  { %v1437_v13 = vpop.f32.mrb[12].mxu1 }
 0x5cb   :  { %v1361_v14 = vpop.f32.mrb[14].mxu0  ;;  %1679 = vrot.lane.b32.xlu0 %v1437_v13, %s4738_s8  ;;  %v4253_v15 = vpop.f32.mrb[13].mxu1 }
 0x5cc   :  { %1673 = vrot.lane.b32.xlu1 %v1361_v14, %s4729_s27  ;;  %v4248_v16 = vpop.f32.mrb[15].mxu0 }
 0x5cd   :  { %v1816_v16 = vsub.s32 4, %v4901_v60 }
 0x5ce   :  { %v1589_v17 = vpop.f32.mrb[14].mxu1 }
 0x5cf   :  { %v1513_v18 = vpop.f32.mrb[16].mxu0  ;;  %1687 = vrot.lane.b32.xlu0 %v1589_v17, %s4739_s9  ;;  %v4263_v19 = vpop.f32.mrb[15].mxu1  ;;  %v1822_v17 = vsub.s32 5, %v4901_v60 }
 0x5d0   :  { %1681 = vrot.lane.b32.xlu1 %v1513_v18, %s4738_s8  ;;  %v4258_v20 = vpop.f32.mrb[17].mxu0  ;;  %v1817_v18 = vrot.slane %v4904_v62, %v1816_v16 }
 0x5d3   :  { %v1665_v21 = vpop.f32.mrb[18].mxu0 }
 0x5d4   :  { %1689 = vrot.lane.b32.xlu1 %v1665_v21, %s4739_s9  ;;  %v4268_v22 = vpop.f32.mrb[19].mxu0  ;;  %v1823_v21 = vrot.slane %v4904_v62, %v1822_v17 }
 0x639   :  { %v1672_v23 = vpop.permute.xlu0 %1671 }
 0x63a   :  { %v1693_v26 = vsel %vm366_vm2, %v1133_v0, %v1672_v23  ;;  %v257_v0 = vld [vmem:[#allocation6 + $0x80] sm:$0xff] }
 0x63b   :  { %v4485_v2 = vpack.c.bf16 %v258_v3, %v257_v0  ;;  %v2041_v0 = vld [vmem:[#allocation6 + $0xc0] sm:$0xff] }
 0x63d   :  { %v1680_v24 = vpop.permute.xlu0 %1679 }
 0x63e   :  { %v1674_v25 = vpop.permute.xlu1 %1673  ;;  %v1695_v27 = vsel %vm161_vm10, %v1693_v26, %v1680_v24 }
 0x63f   :  { %v1694_v31 = vsel %vm366_vm2, %v1209_v57, %v1674_v25  ;;  %v255_v57 = vld [vmem:[#allocation6 + $0x70] sm:$0xff] }
 0x640   :  { %v4481_v1 = vpack.c.bf16 %v256_v63, %v255_v57  ;;  %v2040_v57 = vld [vmem:[#allocation6 + $0xb8] sm:$0xff] }
 0x641   :  { %v1688_v28 = vpop.permute.xlu0 %1687 }
 0x642   :  { %v1682_v29 = vpop.permute.xlu1 %1681  ;;  %v1698_v30 = vsel %vm1697_vm3, %v1695_v27, %v1688_v28  ;;  %4482 = vmatprep.subr.bf16.mxu1 %v4481_v1  ;;  %v261_v28 = vld [vmem:[#allocation6 + $0xa0] sm:$0xff] }
 0x643   :  { %4277 = vmatprep.mubr.msk.f32.mxu1 %vm268_vm0, %v1698_v30  ;;  %v1696_v32 = vsel %vm161_vm10, %v1694_v31, %v1682_v29  ;;  %v262_v29 = vld [vmem:[#allocation6 + $0xa8] sm:$0xff]  ;;  %v1828_v31 = vsub.s32 2, %v4901_v60 }
 0x644   :  { %v4493_v30 = vpack.c.bf16 %v262_v29, %v261_v28 }
 0x646   :  { %v1690_v33 = vpop.permute.xlu1 %1689 }
 0x647   :  { %v1699_v34 = vsel %vm1697_vm3, %v1696_v32, %v1690_v33  ;;  %v1829_v32 = vrot.slane %v4904_v62, %v1828_v31 }
 0x648   :  { %4278 = vmatmul.mubr.msk.f32.vlgmr.msra.gmra.mrb[16].mxu1 %vm268_vm0, %v1699_v34 }
 0x649   :  { %4484 = vmatpush3.bf16.msra.mxu1 %v4481_v1  ;;  %v2042_v1 = vld [vmem:[#allocation6 + $0xc8] sm:$0xff] }
 0x64a   :  { %4486 = vmatprep.subr.bf16.mxu1 %v4485_v2  ;;  %v4501_v3 = vpack.c.bf16 %v2042_v1, %v2041_v0 }
 0x64d   :  { %4488 = vmatpush3.bf16.msra.mxu1 %v4485_v2 }
 0x64e   :  { %4490 = vmatprep.subr.bf16.mxu1 %v4489_v6 }
 0x651   :  { %4492 = vmatpush3.bf16.msra.mxu1 %v4489_v6 }
 0x652   :  { %4494 = vmatprep.subr.bf16.mxu1 %v4493_v30 }
 0x655   :  { %4496 = vmatpush3.bf16.msra.mxu1 %v4493_v30 }
 0x656   :  { %4331 = vmatprep.subr.mxu1 %v4731_v7 }
 0x71b   :  { %v4279_v37 = vpop.f32.mrb[16].mxu1 }
 0x71c   :  { %v1782_v9 = vadd.f32 %v4279_v37, %v1703_v36  ;;  %v1776_v10 = vpop.f32.mrb[17].mxu1 }
 0x71d   :  { %v1777_v38 = vadd.f32 %v1776_v10, %v1703_v36 }
 0x71e   :  { %v1786_v39 = vadd.f32 %v4892_v58, %v1782_v9 }
 0x71f   :  { %v1785_v40 = vadd.f32 %v1777_v38, %v4894_v59  ;;  %v251_v59 = vld [vmem:[#allocation6 + $0x50] sm:$0xff]  ;;  %v1915_v38 = vsub.s32 3, %v4901_v60 }
 0x720   :  { %v1790_v41 = vsel %vm268_vm0, %v1786_v39, 0.0  ;;  %v4473_v53 = vpack.c.bf16 %v252_v52, %v251_v59 }
 0x721   :  { %1791 = vadd.xlane.f32.xlu1 %v1790_v41  ;;  %v1787_v42 = vsel %vm268_vm0, %v1785_v40, 0.0 }
 0x722   :  { %1788 = vadd.xlane.f32.xlu0 %v1787_v42  ;;  %4474 = vmatprep.subr.bf16.mxu0 %v4473_v53 }
 0x723   :  { %4476 = vmatpush3.bf16.msra.mxu0 %v4473_v53 }
 0x724   :  { %4478 = vmatprep.subr.bf16.mxu0 %v4477_v56 }
 0x727   :  { %4480 = vmatpush3.bf16.msra.mxu0 %v4477_v56  ;;  %v2039_v56 = vld [vmem:[#allocation6 + $0xb0] sm:$0xff] }
 0x728   :  { %v4497_v63 = vpack.c.bf16 %v2040_v57, %v2039_v56 }
 0x72a   :  { %4498 = vmatprep.subr.bf16.mxu0 %v4497_v63 }
 0x7ae   :  { %v1792_v43 = vpop.xlane.xlu1 %1791 }
 0x7af   :  { %v1795_v44 = vmul.f32 0.03125, %v1792_v43  ;;  %v1789_v45 = vpop.xlane.xlu0 %1788 }
 0x7b0   :  { %v1794_v46 = vmul.f32 0.03125, %v1789_v45 }
 0x7b1   :  { %v1797_v47 = vsub.f32 %v1786_v39, %v1795_v44  ;;  %v1916_v39 = vrot.slane %v4904_v62, %v1915_v38 }
 0x7b2   :  { %v1796_v48 = vsub.f32 %v1785_v40, %v1794_v46 }
 0x7b3   :  { %v1799_v51 = vmul.f32 %v1797_v47, %v1797_v47 }
 0x7b4   :  { %v1798_v49 = vmul.f32 %v1796_v48, %v1796_v48 }
 0x7b5   :  { %v1803_v58 = vsel %vm268_vm0, %v1799_v51, 0.0 }
 0x7b6   :  { %v1800_v50 = vsel %vm268_vm0, %v1798_v49, 0.0 }
 0x7b7   :  { %1801 = vadd.xlane.f32.xlu0 %v1800_v50 }
 0x7bb   :  { %1804 = vadd.xlane.f32.xlu0 %v1803_v58 }
 0x844   :  { %v1802_v8 = vpop.xlane.xlu0 %1801 }
 0x845   :  { %v1806_v11 = vmul.f32 0.03125, %v1802_v8 }
 0x847   :  { %v1808_v12 = vadd.f32 1e-05, %v1806_v11 }
 0x848   :  { %v1805_v13 = vpop.xlane.xlu0 %1804 }
 0x849   :  { %4592 = vrsqrt.f32 %v1808_v12  ;;  %v1807_v14 = vmul.f32 0.03125, %v1805_v13  ;;  %v2029_v12 = vsub.s32 6, %v4901_v60  ;;  %v2035_v13 = vsub.s32 7, %v4901_v60 }
 0x84b   :  { %v1809_v15 = vadd.f32 1e-05, %v1807_v14  ;;  %v2030_v14 = vrot.slane %v4904_v62, %v2029_v12 }
 0x84d   :  { %4594 = vrsqrt.f32 %v1809_v15 }
 0x853   :  { %v4593_v19 = vpop.eup %4592 }
 0x854   :  { %v1812_v20 = vmul.f32 %v4593_v19, %v1796_v48 }
 0x856   :  { %v1818_v22 = vmul.f32 %v1817_v18, %v1812_v20 }
 0x857   :  { %v4595_v23 = vpop.eup %4594 }
 0x858   :  { %v1813_v24 = vmul.f32 %v4595_v23, %v1797_v47  ;;  %v1824_v25 = vadd.f32 %v1823_v21, %v1818_v22 }
 0x85a   :  { %v1819_v26 = vmul.f32 %v1817_v18, %v1813_v24  ;;  %4288 = vmatprep.mubr.msk.f32.mxu0 %vm268_vm0, %v1824_v25 }
 0x85c   :  { %v1825_v27 = vadd.f32 %v1823_v21, %v1819_v26  ;;  %v2036_v21 = vrot.slane %v4904_v62, %v2035_v13  ;;  %v5145_v26 = vld [vmem:[#allocation7 + $0x8] sm:$0xff] }
 0x85d   :  { %v2063_v62 = vrot.slane %v5145_v26, %v266_v61 }
 0x85e   :  { %4289 = vmatmul.mubr.msk.f32.vlgmr.msra.gmra.mrb[20].mxu0 %vm268_vm0, %v1825_v27 }
 0x85f   :  { %4500 = vmatpush3.bf16.msra.mxu0 %v4497_v63 }
 0x860   :  { %4502 = vmatprep.subr.bf16.mxu0 %v4501_v3 }
 0x863   :  { %4504 = vmatpush3.bf16.msra.mxu0 %v4501_v3 }
 0x864   :  { %4321 = vmatprep.subr.mxu0 %v4731_v7 }
 0x931   :  { %v4290_v33 = vpop.f32.mrb[20].mxu0 }
 0x932   :  { %v1908_v34 = vadd.f32 %v4290_v33, %v1829_v32  ;;  %v1902_v36 = vpop.f32.mrb[21].mxu0 }
 0x933   :  { %v1903_v37 = vadd.f32 %v1902_v36, %v1829_v32 }
 0x934   :  { %v1912_v10 = vmax.f32 %v1908_v34, 0.0 }
 0x935   :  { %v1911_v9 = vmax.f32 %v1903_v37, 0.0 }
 0x937   :  { %4307 = vmatprep.mubr.msk.f32.mxu1 %vm1917_vm4, %v1911_v9 }
 0x938   :  { %4308 = vmatmul.mubr.msk.f32.vlgmr.msra.gmra.mrb[18].mxu1 %vm1917_vm4, %v1912_v10 }
 0x939   :  { %4333 = vmatprep.mubr.msk.f32.mxu1 %vm4734_vm1, %v4731_v7 }
 0xa0b   :  { %v4309_v40 = vpop.f32.mrb[18].mxu1 }
 0xa0c   :  { %v1996_v41 = vadd.f32 %v4309_v40, %v1916_v39  ;;  %v1990_v42 = vpop.f32.mrb[19].mxu1 }
 0xa0d   :  { %v1991_v43 = vadd.f32 %v1990_v42, %v1916_v39 }
 0xa0e   :  { %v2000_v44 = vadd.f32 %v1996_v41, %v1825_v27 }
 0xa0f   :  { %v1999_v45 = vadd.f32 %v1991_v43, %v1824_v25 }
 0xa10   :  { %v2004_v46 = vsel %vm268_vm0, %v2000_v44, 0.0 }
 0xa11   :  { %2005 = vadd.xlane.f32.xlu0 %v2004_v46  ;;  %v2001_v47 = vsel %vm268_vm0, %v1999_v45, 0.0 }
 0xa12   :  { %2002 = vadd.xlane.f32.xlu1 %v2001_v47 }
 0xa9e   :  { %v2006_v48 = vpop.xlane.xlu0 %2005 }
 0xa9f   :  { %v2008_v49 = vmul.f32 0.03125, %v2006_v48  ;;  %v2003_v50 = vpop.xlane.xlu1 %2002 }
 0xaa0   :  { %v2007_v51 = vmul.f32 0.03125, %v2003_v50 }
 0xaa1   :  { %v2010_v58 = vsub.f32 %v2000_v44, %v2008_v49 }
 0xaa2   :  { %v2009_v59 = vsub.f32 %v1999_v45, %v2007_v51 }
 0xaa3   :  { %v2012_v52 = vmul.f32 %v2010_v58, %v2010_v58 }
 0xaa4   :  { %v2011_v53 = vmul.f32 %v2009_v59, %v2009_v59 }
 0xaa5   :  { %v2016_v54 = vsel %vm268_vm0, %v2012_v52, 0.0 }
 0xaa6   :  { %2017 = vadd.xlane.f32.xlu0 %v2016_v54  ;;  %v2013_v55 = vsel %vm268_vm0, %v2011_v53, 0.0 }
 0xaa7   :  { %2014 = vadd.xlane.f32.xlu1 %v2013_v55 }
 0xb33   :  { %v2018_v2 = vpop.xlane.xlu0 %2017 }
 0xb34   :  { %v2020_v4 = vmul.f32 0.03125, %v2018_v2  ;;  %v2015_v5 = vpop.xlane.xlu1 %2014 }
 0xb35   :  { %v2019_v6 = vmul.f32 0.03125, %v2015_v5 }
 0xb36   :  { %v2022_v8 = vadd.f32 1e-05, %v2020_v4 }
 0xb37   :  { %v2021_v11 = vadd.f32 1e-05, %v2019_v6 }
 0xb38   :  { %4596 = vrsqrt.f32 %v2022_v8 }
 0xb39   :  { %4598 = vrsqrt.f32 %v2021_v11 }
 0xb42   :  { %v4597_v15 = vpop.eup %4596 }
 0xb43   :  { %v4599_v18 = vpop.eup %4598  ;;  %v2026_v19 = vmul.f32 %v4597_v15, %v2010_v58 }
 0xb44   :  { %v2025_v20 = vmul.f32 %v4599_v18, %v2009_v59 }
 0xb45   :  { %v2032_v22 = vmul.f32 %v2030_v14, %v2026_v19 }
 0xb46   :  { %v2031_v23 = vmul.f32 %v2030_v14, %v2025_v20 }
 0xb47   :  { %v5137_v25 = vadd.f32 %v2036_v21, %v2032_v22 }
 0xb48   :  { %v5135_v24 = vadd.f32 %v2036_v21, %v2031_v23 }
 0xb4a   :  { %4318 = vmatprep.mubr.msk.f32.mxu0 %vm268_vm0, %v5135_v24 }
 0xb4b   :  { %4319 = vmatmul.mubr.msk.f32.vlgmr.msra.gmra.mrb[22].mxu0 %vm268_vm0, %v5137_v25 }
 0xb4c   :  { %4323 = vmatprep.mubr.msk.f32.mxu0 %vm4734_vm1, %v4731_v7 }
 0xc1e   :  { %v4320_v27 = vpop.f32.mrb[22].mxu0 }
 0xc1f   :  { %v5150_v28 = vadd.f32 %v4320_v27, %v2063_v62  ;;  %v2136_v29 = vpop.f32.mrb[23].mxu0 }
 0xc20   :  { %v5152_v30 = vadd.f32 %v2136_v29, %v2063_v62 }
 0xc21   :  { %2149 = vrot.lane.b32.xlu0 %v5150_v28, %s4733_s4 }
 0xc22   :  { %2147 = vrot.lane.b32.xlu1 %v5152_v30, %s4733_s4 }
 0xc25   :  { %2155 = vrot.lane.b32.xlu0 %v5152_v30, %s4735_s5 }
 0xc26   :  { %2151 = vrot.lane.b32.xlu1 %v5152_v30, %s4732_s30 }
 0xc29   :  { %2159 = vrot.lane.b32.xlu0 %v5152_v30, %s4736_s6 }
 0xc2a   :  { %2153 = vrot.lane.b32.xlu1 %v5150_v28, %s4732_s30 }
 0xc2e   :  { %2157 = vrot.lane.b32.xlu1 %v5150_v28, %s4735_s5 }
 0xc32   :  { %2235 = vrot.lane.b32.xlu1 %v5150_v28, %s4736_s6 }
 0xc93   :  { %v5170_v61 = vpop.permute.xlu0 %2149 }
 0xc94   :  { %2387 = vrot.lane.b32.xlu1 %v5170_v61, %s4736_s6  ;;  %v5174_v32 = vpop.permute.xlu1 %2147 }
 0xc95   :  { %2311 = vrot.lane.b32.xlu0 %v5174_v32, %s4736_s6 }
 0xc97   :  { %v5178_v33 = vpop.permute.xlu0 %2155 }
 0xc98   :  { %v5180_v34 = vpop.permute.xlu1 %2151 }
 0xc99   :  { %2463 = vrot.lane.b32.xlu0 %v5180_v34, %s4736_s6 }
 0xc9b   :  { %v2160_v36 = vpop.permute.xlu0 %2159 }
 0xc9c   :  { %4322 = vmatpush3.xpose.msk.msra.mxu0 %vm366_vm2, %v2160_v36  ;;  %v5185_v37 = vpop.permute.xlu1 %2153 }
 0xc9d   :  { %2615 = vrot.lane.b32.xlu0 %v5178_v33, %s4736_s6  ;;  %2539 = vrot.lane.b32.xlu1 %v5185_v37, %s4736_s6 }
 0xc9e   :  { %4326 = vmatprep.subr.mxu0 %v4731_v7 }
 0xc9f   :  { %4324 = vmatmul.mubr.msk.f32.vlgmr.msra.gmra.mrb[24].mxu0 %vm366_vm2, %v5152_v30 }
 0xca0   :  { %v5194_v9 = vpop.permute.xlu1 %2157  ;;  %4328 = vmatprep.mubr.msk.f32.mxu0 %vm4734_vm1, %v4731_v7 }
 0xca1   :  { %2691 = vrot.lane.b32.xlu1 %v5194_v9, %s4736_s6 }
 0xca4   :  { %v2236_v10 = vpop.permute.xlu1 %2235 }
 0xca5   :  { %4327 = vmatpush3.xpose.msk.msra.mxu0 %vm366_vm2, %v2236_v10 }
 0xca6   :  { %4336 = vmatprep.subr.mxu0 %v4731_v7 }
 0xca8   :  { %4329 = vmatmul.mubr.msk.f32.vlgmr.msra.gmra.mrb[26].mxu0 %vm366_vm2, %v5150_v28 }
 0xca9   :  { %4338 = vmatprep.mubr.msk.f32.mxu0 %vm4734_vm1, %v4731_v7 }
 0xd06   :  { %v2388_v39 = vpop.permute.xlu1 %2387 }
 0xd07   :  { %v2312_v40 = vpop.permute.xlu0 %2311  ;;  %4337 = vmatpush3.xpose.msk.msra.mxu0 %vm366_vm2, %v2388_v39 }
 0xd08   :  { %4332 = vmatpush3.xpose.msk.msra.mxu1 %vm366_vm2, %v2312_v40  ;;  %4346 = vmatprep.subr.mxu0 %v4731_v7 }
 0xd09   :  { %4341 = vmatprep.subr.mxu1 %v4731_v7 }
 0xd0a   :  { %4339 = vmatmul.mubr.msk.f32.vlgmr.msra.gmra.mrb[28].mxu0 %vm366_vm2, %v5170_v61 }
 0xd0b   :  { %4334 = vmatmul.mubr.msk.f32.vlgmr.msra.gmra.mrb[20].mxu1 %vm366_vm2, %v5174_v32  ;;  %v2464_v41 = vpop.permute.xlu0 %2463  ;;  %4348 = vmatprep.mubr.msk.f32.mxu0 %vm4734_vm1, %v4731_v7 }
 0xd0c   :  { %4342 = vmatpush3.xpose.msk.msra.mxu1 %vm366_vm2, %v2464_v41  ;;  %4343 = vmatprep.mubr.msk.f32.mxu1 %vm4734_vm1, %v4731_v7 }
 0xd0d   :  { %4351 = vmatprep.subr.mxu1 %v4731_v7 }
 0xd0f   :  { %4344 = vmatmul.mubr.msk.f32.vlgmr.msra.gmra.mrb[22].mxu1 %vm366_vm2, %v5180_v34  ;;  %v2616_v42 = vpop.permute.xlu0 %2615  ;;  %v2540_v43 = vpop.permute.xlu1 %2539 }
 0xd10   :  { %4347 = vmatpush3.xpose.msk.msra.mxu0 %vm366_vm2, %v2540_v43  ;;  %4352 = vmatpush3.xpose.msk.msra.mxu1 %vm366_vm2, %v2616_v42 }
 0xd11   :  { %4353 = vmatprep.mubr.msk.f32.mxu1 %vm4734_vm1, %v4731_v7  ;;  %4356 = vmatprep.subr.mxu0 %v4731_v7 }
 0xd12   :  { %4361 = vmatprep.subr.mxu1 %v4731_v7 }
 0xd13   :  { %4349 = vmatmul.mubr.msk.f32.vlgmr.msra.gmra.mrb[30].mxu0 %vm366_vm2, %v5185_v37  ;;  %4354 = vmatmul.mubr.msk.f32.vlgmr.msra.gmra.mrb[24].mxu1 %vm366_vm2, %v5178_v33  ;;  %v2692_v44 = vpop.permute.xlu1 %2691 }
 0xd14   :  { %4357 = vmatpush3.xpose.msk.msra.mxu0 %vm366_vm2, %v2692_v44  ;;  %4358 = vmatprep.mubr.msk.f32.mxu0 %vm4734_vm1, %v4731_v7 }
 0xd15   :  { %4366 = vmatprep.subr.mxu0 %v4731_v7  ;;  %4363 = vmatprep.mubr.msk.f32.mxu1 %vm4734_vm1, %v4731_v7 }
 0xd17   :  { %4359 = vmatmul.mubr.msk.f32.vlgmr.msra.gmra.mrb[32].mxu0 %vm366_vm2, %v5194_v9 }
 0xd18   :  { %4368 = vmatprep.mubr.msk.f32.mxu0 %vm4734_vm1, %v4731_v7 }
 0xd72   :  { %v2231_v45 = vpop.f32.mrb[24].mxu0 }
 0xd73   :  { %v4325_v46 = vpop.f32.mrb[25].mxu0  ;;  %v2767_v47 = vsel %vm366_vm2, %v2231_v45, -inf }
 0xd74   :  { %2768 = vmax.xlane.f32.xlu0 %v2767_v47 }
 0xd7b   :  { %v2307_v48 = vpop.f32.mrb[26].mxu0 }
 0xd7c   :  { %v4330_v49 = vpop.f32.mrb[27].mxu0  ;;  %v2770_v50 = vsel %vm366_vm2, %v2307_v48, -inf }
 0xd7d   :  { %2771 = vmax.xlane.f32.xlu1 %v2770_v50 }
 0xddd   :  { %v2459_v51 = vpop.f32.mrb[28].mxu0 }
 0xdde   :  { %v2383_v58 = vpop.f32.mrb[20].mxu1  ;;  %v4340_v59 = vpop.f32.mrb[29].mxu0  ;;  %v2776_v57 = vsel %vm366_vm2, %v2459_v51, -inf }
 0xddf   :  { %v4335_v52 = vpop.f32.mrb[21].mxu1  ;;  %v2773_v53 = vsel %vm366_vm2, %v2383_v58, -inf }
 0xde0   :  { %2774 = vmax.xlane.f32.xlu0 %v2773_v53 }
 0xde2   :  { %v2535_v54 = vpop.f32.mrb[22].mxu1 }
 0xde3   :  { %v4345_v55 = vpop.f32.mrb[23].mxu1  ;;  %v2779_v56 = vsel %vm366_vm2, %v2535_v54, -inf }
 0xde4   :  { %2780 = vmax.xlane.f32.xlu1 %v2779_v56  ;;  %2777 = vmax.xlane.f32.xlu0 %v2776_v57 }
 0xde6   :  { %v2611_v63 = vpop.f32.mrb[30].mxu0  ;;  %v2687_v0 = vpop.f32.mrb[24].mxu1 }
 0xde7   :  { %v4350_v1 = vpop.f32.mrb[31].mxu0  ;;  %v4355_v3 = vpop.f32.mrb[25].mxu1  ;;  %v2785_v2 = vsel %vm366_vm2, %v2687_v0, -inf  ;;  %v2782_v4 = vsel %vm366_vm2, %v2611_v63, -inf }
 0xde8   :  { %2786 = vmax.xlane.f32.xlu1 %v2785_v2  ;;  %2783 = vmax.xlane.f32.xlu0 %v2782_v4 }
 0xdea   :  { %v2763_v5 = vpop.f32.mrb[32].mxu0 }
 0xdeb   :  { %v4360_v6 = vpop.f32.mrb[33].mxu0  ;;  %v2788_v8 = vsel %vm366_vm2, %v2763_v5, -inf }
 0xdec   :  { %2789 = vmax.xlane.f32.xlu0 %v2788_v8 }
 0xdf9   :  { %2855 = vrot.lane.b32.xlu1 %v5152_v30, %s4737_s7 }
 0xdfd   :  { %3007 = vrot.lane.b32.xlu1 %v5174_v32, %s4737_s7 }
 0xe01   :  { %3083 = vrot.lane.b32.xlu1 %v5170_v61, %s4737_s7  ;;  %v2769_v15 = vpop.xlane.xlu0 %2768 }
 0xe02   :  { %2931 = vrot.lane.b32.xlu0 %v5150_v28, %s4737_s7  ;;  %v2791_v18 = vsub.f32 %v2231_v45, %v2769_v15 }
 0xe04   :  { %v2799_v20 = vmul.f32 1.442695, %v2791_v18 }
 0xe05   :  { %3235 = vrot.lane.b32.xlu1 %v5185_v37, %s4737_s7 }
 0xe06   :  { %3159 = vrot.lane.b32.xlu0 %v5180_v34, %s4737_s7 }
 0xe0a   :  { %v2772_v11 = vpop.xlane.xlu1 %2771 }
 0xe0b   :  { %v2792_v14 = vsub.f32 %v2307_v48, %v2772_v11 }
 0xe0d   :  { %v2801_v19 = vmul.f32 1.442695, %v2792_v14 }
 0xe0f   :  { %4600 = vpow2.f32 %v2801_v19 }
 0xe10   :  { %4602 = vpow2.f32 %v2799_v20 }
 0xe19   :  { %v5262_v21 = vpop.eup %4600 }
 0xe1a   :  { %v2818_v22 = vsel %vm366_vm2, %v5262_v21, 0.0  ;;  %v5266_v23 = vpop.eup %4602 }
 0xe1b   :  { %v2815_v62 = vsel %vm366_vm2, %v5266_v23, 0.0 }
 0xe25   :  { %2819 = vadd.xlane.f32.xlu0 %v2818_v22 }
 0xe29   :  { %2816 = vadd.xlane.f32.xlu1 %v2815_v62 }
 0xe6d   :  { %v2775_v27 = vpop.xlane.xlu0 %2774 }
 0xe6e   :  { %v2793_v28 = vsub.f32 %v2383_v58, %v2775_v27 }
 0xe70   :  { %v2803_v29 = vmul.f32 1.442695, %v2793_v28 }
 0xe71   :  { %v2778_v30 = vpop.xlane.xlu0 %2777  ;;  %v2781_v61 = vpop.xlane.xlu1 %2780 }
 0xe72   :  { %4604 = vpow2.f32 %v2803_v29  ;;  %v2794_v32 = vsub.f32 %v2459_v51, %v2778_v30  ;;  %v2795_v34 = vsub.f32 %v2535_v54, %v2781_v61 }
 0xe74   :  { %v2805_v36 = vmul.f32 1.442695, %v2794_v32  ;;  %v2807_v37 = vmul.f32 1.442695, %v2795_v34 }
 0xe75   :  { %v2784_v10 = vpop.xlane.xlu0 %2783  ;;  %v2787_v39 = vpop.xlane.xlu1 %2786 }
 0xe76   :  { %4606 = vpow2.f32 %v2805_v36  ;;  %v2796_v40 = vsub.f32 %v2611_v63, %v2784_v10  ;;  %v2797_v41 = vsub.f32 %v2687_v0, %v2787_v39 }
 0xe77   :  { %4608 = vpow2.f32 %v2807_v37 }
 0xe78   :  { %v2809_v42 = vmul.f32 1.442695, %v2796_v40  ;;  %v2811_v43 = vmul.f32 1.442695, %v2797_v41 }
 0xe79   :  { %v2790_v44 = vpop.xlane.xlu0 %2789  ;;  %v2856_v45 = vpop.permute.xlu1 %2855 }
 0xe7a   :  { %4610 = vpow2.f32 %v2809_v42  ;;  %v2798_v46 = vsub.f32 %v2763_v5, %v2790_v44  ;;  %4362 = vmatpush3.msra.mxu1 %v2856_v45  ;;  %v2044_v44 = vld [vmem:[#allocation6 + $0xd8] sm:$0xff] }
 0xe7b   :  { %4612 = vpow2.f32 %v2811_v43  ;;  %4371 = vmatprep.subr.mxu1 %v4731_v7  ;;  %v2043_v43 = vld [vmem:[#allocation6 + $0xd0] sm:$0xff] }
 0xe7c   :  { %v4605_v47 = vpop.eup %4604  ;;  %v2813_v48 = vmul.f32 1.442695, %v2798_v46  ;;  %v4505_v45 = vpack.c.bf16 %v2044_v44, %v2043_v43  ;;  %v2045_v46 = vld [vmem:[#allocation6 + $0xe0] sm:$0xff]  ;;  %v2052_v43 = vld [vmem:[#allocation6 + $0x118] sm:$0xff] }
 0xe7d   :  { %v2932_v49 = vpop.permute.xlu0 %2931  ;;  %v2821_v50 = vsel %vm366_vm2, %v4605_v47, 0.0  ;;  %v3008_v0 = vpop.permute.xlu1 %3007  ;;  %v2053_v44 = vld [vmem:[#allocation6 + $0x120] sm:$0xff] }
 0xe7e   :  { %4614 = vpow2.f32 %v2813_v48  ;;  %2822 = vadd.xlane.f32.xlu1 %v2821_v50  ;;  %4367 = vmatpush3.msra.mxu0 %v2932_v49 }
 0xe7f   :  { %4376 = vmatprep.subr.mxu0 %v4731_v7 }
 0xe80   :  { %v4607_v51 = vpop.eup %4606 }
 0xe81   :  { %v4609_v58 = vpop.eup %4608  ;;  %v2824_v59 = vsel %vm366_vm2, %v4607_v51, 0.0  ;;  %v3084_v1 = vpop.permute.xlu1 %3083 }
 0xe82   :  { %2825 = vadd.xlane.f32.xlu0 %v2824_v59  ;;  %v2827_v52 = vsel %vm366_vm2, %v4609_v58, 0.0  ;;  %v3160_v3 = vpop.permute.xlu0 %3159 }
 0xe83   :  { %2828 = vadd.xlane.f32.xlu1 %v2827_v52 }
 0xe84   :  { %v4611_v53 = vpop.eup %4610 }
 0xe85   :  { %v4613_v54 = vpop.eup %4612  ;;  %v2830_v55 = vsel %vm366_vm2, %v4611_v53, 0.0  ;;  %v3236_v2 = vpop.permute.xlu1 %3235 }
 0xe86   :  { %2831 = vadd.xlane.f32.xlu0 %v2830_v55  ;;  %v2833_v56 = vsel %vm366_vm2, %v4613_v54, 0.0 }
 0xe87   :  { %2834 = vadd.xlane.f32.xlu1 %v2833_v56 }
 0xe88   :  { %v5277_v57 = vpop.eup %4614 }
 0xe89   :  { %v2836_v63 = vsel %vm366_vm2, %v5277_v57, 0.0 }
 0xe8a   :  { %2837 = vadd.xlane.f32.xlu0 %v2836_v63 }
 0xe98   :  { %3387 = vrot.lane.b32.xlu1 %v5194_v9, %s4737_s7 }
 0xea0   :  { %3311 = vrot.lane.b32.xlu0 %v5178_v33, %s4737_s7 }
 0xeb2   :  { %v2820_v4 = vpop.xlane.xlu0 %2819 }
 0xeb3   :  { %4616 = vrcp.f32 %v2820_v4 }
 0xeb6   :  { %v2817_v5 = vpop.xlane.xlu1 %2816 }
 0xeb7   :  { %4618 = vrcp.f32 %v2817_v5 }
 0xebd   :  { %v4617_v6 = vpop.eup %4616 }
 0xebe   :  { %v2848_v8 = vmul.f32 %v4617_v6, %v5262_v21 }
 0xec0   :  { %4369 = vmatmul.mubr.msk.f32.vlgmr.msra.gmra.mrb[34].mxu0 %vm366_vm2, %v2848_v8 }
 0xec1   :  { %v4619_v11 = vpop.eup %4618  ;;  %4377 = vmatpush3.msra.mxu0 %v3084_v1  ;;  %4378 = vmatprep.mubr.msk.f32.mxu0 %vm4734_vm1, %v4731_v7 }
 0xec2   :  { %v2847_v33 = vmul.f32 %v4619_v11, %v5266_v23  ;;  %4386 = vmatprep.subr.mxu0 %v4731_v7 }
 0xec4   :  { %4364 = vmatmul.mubr.msk.f32.vlgmr.msra.gmra.mrb[26].mxu1 %vm366_vm2, %v2847_v33 }
 0xec5   :  { %4372 = vmatpush3.msra.mxu1 %v3008_v0  ;;  %4373 = vmatprep.mubr.msk.f32.mxu1 %vm4734_vm1, %v4731_v7 }
 0xec6   :  { %4381 = vmatprep.subr.mxu1 %v4731_v7 }
 0xf0b   :  { %v2823_v9 = vpop.xlane.xlu1 %2822 }
 0xf0c   :  { %4620 = vrcp.f32 %v2823_v9 }
 0xf0f   :  { %v2826_v14 = vpop.xlane.xlu0 %2825 }
 0xf10   :  { %4622 = vrcp.f32 %v2826_v14  ;;  %v2829_v15 = vpop.xlane.xlu1 %2828  ;;  %v3496_v14 = vrot.slane %v5145_v26, %v1702_v35 }
 0xf11   :  { %4624 = vrcp.f32 %v2829_v15 }
 0xf13   :  { %v2832_v18 = vpop.xlane.xlu0 %2831 }
 0xf14   :  { %4626 = vrcp.f32 %v2832_v18  ;;  %v2835_v19 = vpop.xlane.xlu1 %2834 }
 0xf15   :  { %4628 = vrcp.f32 %v2835_v19 }
 0xf16   :  { %v4621_v20 = vpop.eup %4620 }
 0xf17   :  { %v2849_v21 = vmul.f32 %v4621_v20, %v4605_v47  ;;  %v2838_v22 = vpop.xlane.xlu0 %2837  ;;  %v2046_v47 = vld [vmem:[#allocation6 + $0xe8] sm:$0xff] }
 0xf18   :  { %4630 = vrcp.f32 %v2838_v22  ;;  %v3388_v36 = vpop.permute.xlu1 %3387  ;;  %v4509_v48 = vpack.c.bf16 %v2046_v47, %v2045_v46  ;;  %v2054_v46 = vld [vmem:[#allocation6 + $0x128] sm:$0xff] }
 0xf19   :  { %4374 = vmatmul.mubr.msk.f32.vlgmr.msra.gmra.mrb[28].mxu1 %vm366_vm2, %v2849_v21  ;;  %v4525_v47 = vpack.c.bf16 %v2054_v46, %v2053_v44 }
 0xf1a   :  { %v4623_v23 = vpop.eup %4622  ;;  %4382 = vmatpush3.msra.mxu1 %v3160_v3  ;;  %4383 = vmatprep.mubr.msk.f32.mxu1 %vm4734_vm1, %v4731_v7 }
 0xf1b   :  { %v4625_v62 = vpop.eup %4624  ;;  %v2850_v27 = vmul.f32 %v4623_v23, %v4607_v51  ;;  %4391 = vmatprep.subr.mxu1 %v4731_v7  ;;  %v3312_v29 = vpop.permute.xlu0 %3311 }
 0xf1c   :  { %v2851_v28 = vmul.f32 %v4625_v62, %v4609_v58 }
 0xf1d   :  { %4379 = vmatmul.mubr.msk.f32.vlgmr.msra.gmra.mrb[36].mxu0 %vm366_vm2, %v2850_v27 }
 0xf1e   :  { %v4627_v30 = vpop.eup %4626  ;;  %4384 = vmatmul.mubr.msk.f32.vlgmr.msra.gmra.mrb[30].mxu1 %vm366_vm2, %v2851_v28  ;;  %4387 = vmatpush3.msra.mxu0 %v3236_v2 }
 0xf1f   :  { %v4629_v61 = vpop.eup %4628  ;;  %v2852_v32 = vmul.f32 %v4627_v30, %v4611_v53  ;;  %4392 = vmatpush3.msra.mxu1 %v3312_v29  ;;  %4388 = vmatprep.mubr.msk.f32.mxu0 %vm4734_vm1, %v4731_v7 }
 0xf20   :  { %v2853_v34 = vmul.f32 %v4629_v61, %v4613_v54  ;;  %4393 = vmatprep.mubr.msk.f32.mxu1 %vm4734_vm1, %v4731_v7  ;;  %4396 = vmatprep.subr.mxu0 %v4731_v7 }
 0xf21   :  { %4389 = vmatmul.mubr.msk.f32.vlgmr.msra.gmra.mrb[38].mxu0 %vm366_vm2, %v2852_v32  ;;  %4506 = vmatprep.subr.bf16.mxu1 %v4505_v45 }
 0xf22   :  { %v4631_v37 = vpop.eup %4630  ;;  %4394 = vmatmul.mubr.msk.f32.vlgmr.msra.gmra.mrb[32].mxu1 %vm366_vm2, %v2853_v34  ;;  %4397 = vmatpush3.msra.mxu0 %v3388_v36 }
 0xf23   :  { %v2854_v10 = vmul.f32 %v4631_v37, %v5277_v57  ;;  %4398 = vmatprep.mubr.msk.f32.mxu0 %vm4734_vm1, %v4731_v7  ;;  %4508 = vmatpush3.bf16.msra.mxu1 %v4505_v45  ;;  %v2048_v37 = vld [vmem:[#allocation6 + $0xf8] sm:$0xff] }
 0xf24   :  { %4510 = vmatprep.subr.bf16.mxu1 %v4509_v48 }
 0xf25   :  { %4399 = vmatmul.mubr.msk.f32.vlgmr.msra.gmra.mrb[40].mxu0 %vm366_vm2, %v2854_v10 }
 0xf27   :  { %4512 = vmatpush3.bf16.msra.mxu1 %v4509_v48  ;;  %v2055_v48 = vld [vmem:[#allocation6 + $0x130] sm:$0xff] }
 0xf93   :  { %v3003_v39 = vpop.f32.mrb[34].mxu0 }
 0xf94   :  { %v4370_v40 = vpop.f32.mrb[35].mxu0 }
 0xf95   :  { %v2050_v40 = vld [vmem:[#allocation6 + $0x108] sm:$0xff] }
 0xf97   :  { %v2927_v41 = vpop.f32.mrb[26].mxu1 }
 0xf98   :  { %v4365_v42 = vpop.f32.mrb[27].mxu1 }
 0xf99   :  { %v2051_v42 = vld [vmem:[#allocation6 + $0x110] sm:$0xff] }
 0xf9a   :  { %v4521_v45 = vpack.c.bf16 %v2052_v43, %v2051_v42 }
 0xf9c   :  { %4522 = vmatprep.subr.bf16.mxu1 %v4521_v45 }
 0xfec   :  { %v3079_v49 = vpop.f32.mrb[28].mxu1 }
 0xfed   :  { %3465 = vrot.lane.b32.xlu0 %v3079_v49, %s4729_s27  ;;  %v4375_v7 = vpop.f32.mrb[29].mxu1  ;;  %v2056_v49 = vld [vmem:[#allocation6 + $0x138] sm:$0xff] }
 0xfee   :  { %v4529_v7 = vpack.c.bf16 %v2056_v49, %v2055_v48  ;;  %v3821_v48 = vrot.slane %v5145_v26, %v2029_v12 }
 0xff0   :  { %v3155_v50 = vpop.f32.mrb[36].mxu0 }
 0xff1   :  { %v3231_v51 = vpop.f32.mrb[30].mxu1  ;;  %3467 = vrot.lane.b32.xlu1 %v3155_v50, %s4729_s27  ;;  %v4380_v58 = vpop.f32.mrb[37].mxu0 }
 0xff2   :  { %3473 = vrot.lane.b32.xlu0 %v3231_v51, %s4738_s8  ;;  %v4385_v59 = vpop.f32.mrb[31].mxu1 }
 0xff4   :  { %v3307_v52 = vpop.f32.mrb[38].mxu0 }
 0xff5   :  { %v3383_v53 = vpop.f32.mrb[32].mxu1  ;;  %3475 = vrot.lane.b32.xlu1 %v3307_v52, %s4738_s8  ;;  %v4390_v54 = vpop.f32.mrb[39].mxu0 }
 0xff6   :  { %3481 = vrot.lane.b32.xlu0 %v3383_v53, %s4739_s9  ;;  %v4395_v55 = vpop.f32.mrb[33].mxu1  ;;  %v3609_v54 = vrot.slane %v5145_v26, %v1816_v16  ;;  %v3621_v16 = vrot.slane %v5145_v26, %v1828_v31 }
 0xff8   :  { %v3459_v56 = vpop.f32.mrb[40].mxu0 }
 0xff9   :  { %3483 = vrot.lane.b32.xlu1 %v3459_v56, %s4739_s9  ;;  %v4400_v57 = vpop.f32.mrb[41].mxu0 }
 0xffa   :  { %v3615_v57 = vrot.slane %v5145_v26, %v1822_v17 }
0x105f   :  { %v3466_v63 = vpop.permute.xlu0 %3465 }
0x1060   :  { %v3487_v3 = vsel %vm366_vm2, %v2927_v41, %v3466_v63 }
0x1063   :  { %v3468_v0 = vpop.permute.xlu1 %3467 }
0x1064   :  { %v3474_v1 = vpop.permute.xlu0 %3473  ;;  %v3488_v8 = vsel %vm366_vm2, %v3003_v39, %v3468_v0  ;;  %v2049_v39 = vld [vmem:[#allocation6 + $0x100] sm:$0xff] }
0x1065   :  { %v3489_v4 = vsel %vm161_vm10, %v3487_v3, %v3474_v1  ;;  %v4517_v41 = vpack.c.bf16 %v2050_v40, %v2049_v39  ;;  %v3832_v39 = vld [vmem:[#allocation6 + $0x160] sm:$0xff]  ;;  %v3833_v40 = vld [vmem:[#allocation6 + $0x168] sm:$0xff] }
0x1067   :  { %v3476_v2 = vpop.permute.xlu1 %3475 }
0x1068   :  { %v3482_v5 = vpop.permute.xlu0 %3481  ;;  %v3490_v11 = vsel %vm161_vm10, %v3488_v8, %v3476_v2 }
0x1069   :  { %v3491_v6 = vsel %vm1697_vm3, %v3489_v4, %v3482_v5  ;;  %v2057_v5 = vld [vmem:[#allocation6 + $0x140] sm:$0xff] }
0x106a   :  { %4409 = vmatprep.mubr.msk.f32.mxu1 %vm268_vm0, %v3491_v6  ;;  %v2058_v6 = vld [vmem:[#allocation6 + $0x148] sm:$0xff] }
0x106b   :  { %v3484_v33 = vpop.permute.xlu1 %3483  ;;  %v4533_v8 = vpack.c.bf16 %v2058_v6, %v2057_v5 }
0x106c   :  { %v3492_v9 = vsel %vm1697_vm3, %v3490_v11, %v3484_v33 }
0x106d   :  { %4410 = vmatmul.mubr.msk.f32.vlgmr.msra.gmra.mrb[34].mxu1 %vm268_vm0, %v3492_v9 }
0x106e   :  { %4524 = vmatpush3.bf16.msra.mxu1 %v4521_v45 }
0x106f   :  { %4526 = vmatprep.subr.bf16.mxu1 %v4525_v47 }
0x1072   :  { %4528 = vmatpush3.bf16.msra.mxu1 %v4525_v47 }
0x1073   :  { %4530 = vmatprep.subr.bf16.mxu1 %v4529_v7 }
0x1076   :  { %4532 = vmatpush3.bf16.msra.mxu1 %v4529_v7 }
0x1077   :  { %4534 = vmatprep.subr.bf16.mxu1 %v4533_v8 }
0x107a   :  { %4536 = vmatpush3.bf16.msra.mxu1 %v4533_v8 }
0x1140   :  { %v4411_v15 = vpop.f32.mrb[34].mxu1 }
0x1141   :  { %v3575_v18 = vadd.f32 %v4411_v15, %v3496_v14  ;;  %v3569_v19 = vpop.f32.mrb[35].mxu1 }
0x1142   :  { %v3570_v20 = vadd.f32 %v3569_v19, %v3496_v14 }
0x1143   :  { %v3579_v21 = vadd.f32 %v3575_v18, %v5137_v25  ;;  %v3708_v18 = vrot.slane %v5145_v26, %v1915_v38 }
0x1144   :  { %v3578_v22 = vadd.f32 %v3570_v20, %v5135_v24  ;;  %v2047_v24 = vld [vmem:[#allocation6 + $0xf0] sm:$0xff] }
0x1145   :  { %v3583_v23 = vsel %vm268_vm0, %v3579_v21, 0.0  ;;  %v4513_v10 = vpack.c.bf16 %v2048_v37, %v2047_v24  ;;  %v3830_v24 = vld [vmem:[#allocation6 + $0x150] sm:$0xff]  ;;  %v3831_v37 = vld [vmem:[#allocation6 + $0x158] sm:$0xff] }
0x1146   :  { %3584 = vadd.xlane.f32.xlu1 %v3583_v23  ;;  %v3580_v62 = vsel %vm268_vm0, %v3578_v22, 0.0 }
0x1147   :  { %3581 = vadd.xlane.f32.xlu0 %v3580_v62  ;;  %4514 = vmatprep.subr.bf16.mxu0 %v4513_v10 }
0x1148   :  { %4516 = vmatpush3.bf16.msra.mxu0 %v4513_v10  ;;  %v4537_v10 = vpack.c.bf16 %v3831_v37, %v3830_v24 }
0x1149   :  { %4518 = vmatprep.subr.bf16.mxu0 %v4517_v41 }
0x114c   :  { %4520 = vmatpush3.bf16.msra.mxu0 %v4517_v41  ;;  %v4541_v41 = vpack.c.bf16 %v3833_v40, %v3832_v39 }
0x114d   :  { %4538 = vmatprep.subr.bf16.mxu0 %v4537_v10 }
0x11d3   :  { %v3585_v27 = vpop.xlane.xlu1 %3584 }
0x11d4   :  { %v3587_v28 = vmul.f32 0.03125, %v3585_v27  ;;  %v3582_v29 = vpop.xlane.xlu0 %3581 }
0x11d5   :  { %v3586_v30 = vmul.f32 0.03125, %v3582_v29 }
0x11d6   :  { %v3589_v61 = vsub.f32 %v3579_v21, %v3587_v28 }
0x11d7   :  { %v3588_v35 = vsub.f32 %v3578_v22, %v3586_v30 }
0x11d8   :  { %v3591_v36 = vmul.f32 %v3589_v61, %v3589_v61 }
0x11d9   :  { %v3590_v32 = vmul.f32 %v3588_v35, %v3588_v35 }
0x11da   :  { %v3595_v25 = vsel %vm268_vm0, %v3591_v36, 0.0 }
0x11db   :  { %v3592_v34 = vsel %vm268_vm0, %v3590_v32, 0.0 }
0x11dc   :  { %3593 = vadd.xlane.f32.xlu0 %v3592_v34 }
0x11e0   :  { %3596 = vadd.xlane.f32.xlu0 %v3595_v25 }
0x1269   :  { %v3594_v50 = vpop.xlane.xlu0 %3593 }
0x126a   :  { %v3598_v51 = vmul.f32 0.03125, %v3594_v50 }
0x126c   :  { %v3600_v58 = vadd.f32 1e-05, %v3598_v51 }
0x126d   :  { %v3597_v59 = vpop.xlane.xlu0 %3596 }
0x126e   :  { %4632 = vrsqrt.f32 %v3600_v58  ;;  %v3599_v52 = vmul.f32 0.03125, %v3597_v59  ;;  %v3827_v58 = vrot.slane %v5145_v26, %v2035_v13 }
0x1270   :  { %v3601_v53 = vadd.f32 1e-05, %v3599_v52 }
0x1272   :  { %4634 = vrsqrt.f32 %v3601_v53 }
0x1278   :  { %v4633_v55 = vpop.eup %4632 }
0x1279   :  { %v3604_v56 = vmul.f32 %v4633_v55, %v3588_v35  ;;  %v4038_v55 = vld [vmem:[#allocation7 + $0x10] ss:$0 sm:$0xff] }
0x127b   :  { %v3610_v63 = vmul.f32 %v3609_v54, %v3604_v56 }
0x127c   :  { %v4635_v0 = vpop.eup %4634 }
0x127d   :  { %v3605_v1 = vmul.f32 %v4635_v0, %v3589_v61  ;;  %v3616_v3 = vadd.f32 %v3615_v57, %v3610_v63 }
0x127f   :  { %v3611_v2 = vmul.f32 %v3609_v54, %v3605_v1  ;;  %4420 = vmatprep.mubr.msk.f32.mxu0 %vm268_vm0, %v3616_v3 }
0x1281   :  { %v3617_v4 = vadd.f32 %v3615_v57, %v3611_v2 }
0x1283   :  { %4421 = vmatmul.mubr.msk.f32.vlgmr.msra.gmra.mrb[42].mxu0 %vm268_vm0, %v3617_v4 }
0x1284   :  { %4540 = vmatpush3.bf16.msra.mxu0 %v4537_v10 }
0x1285   :  { %4542 = vmatprep.subr.bf16.mxu0 %v4541_v41 }
0x1288   :  { %4544 = vmatpush3.bf16.msra.mxu0 %v4541_v41 }
0x1356   :  { %v4422_v17 = vpop.f32.mrb[42].mxu0 }
0x1357   :  { %v3700_v11 = vadd.f32 %v4422_v17, %v3621_v16  ;;  %v3694_v33 = vpop.f32.mrb[43].mxu0 }
0x1358   :  { %v3695_v9 = vadd.f32 %v3694_v33, %v3621_v16 }
0x1359   :  { %v3704_v15 = vmax.f32 %v3700_v11, 0.0 }
0x135a   :  { %v3703_v14 = vmax.f32 %v3695_v9, 0.0 }
0x135c   :  { %4439 = vmatprep.mubr.msk.f32.mxu1 %vm1917_vm4, %v3703_v14 }
0x135d   :  { %4440 = vmatmul.mubr.msk.f32.vlgmr.msra.gmra.mrb[36].mxu1 %vm1917_vm4, %v3704_v15 }
0x1430   :  { %v4441_v19 = vpop.f32.mrb[36].mxu1 }
0x1431   :  { %v3787_v20 = vadd.f32 %v4441_v19, %v3708_v18  ;;  %v3781_v21 = vpop.f32.mrb[37].mxu1 }
0x1432   :  { %v3782_v22 = vadd.f32 %v3781_v21, %v3708_v18 }
0x1433   :  { %v3791_v23 = vadd.f32 %v3787_v20, %v3617_v4 }
0x1434   :  { %v3790_v31 = vadd.f32 %v3782_v22, %v3616_v3 }
0x1435   :  { %v3795_v62 = vsel %vm268_vm0, %v3791_v23, 0.0 }
0x1436   :  { %3796 = vadd.xlane.f32.xlu0 %v3795_v62  ;;  %v3792_v27 = vsel %vm268_vm0, %v3790_v31, 0.0 }
0x1437   :  { %3793 = vadd.xlane.f32.xlu1 %v3792_v27 }
0x14c3   :  { %v3797_v28 = vpop.xlane.xlu0 %3796 }
0x14c4   :  { %v3799_v29 = vmul.f32 0.03125, %v3797_v28  ;;  %v3794_v30 = vpop.xlane.xlu1 %3793 }
0x14c5   :  { %v3798_v61 = vmul.f32 0.03125, %v3794_v30 }
0x14c6   :  { %v3801_v35 = vsub.f32 %v3791_v23, %v3799_v29 }
0x14c7   :  { %v3800_v32 = vsub.f32 %v3790_v31, %v3798_v61 }
0x14c8   :  { %v3803_v34 = vmul.f32 %v3801_v35, %v3801_v35 }
0x14c9   :  { %v3802_v38 = vmul.f32 %v3800_v32, %v3800_v32 }
0x14ca   :  { %v3807_v36 = vsel %vm268_vm0, %v3803_v34, 0.0 }
0x14cb   :  { %3808 = vadd.xlane.f32.xlu0 %v3807_v36  ;;  %v3804_v25 = vsel %vm268_vm0, %v3802_v38, 0.0 }
0x14cc   :  { %3805 = vadd.xlane.f32.xlu1 %v3804_v25 }
0x1558   :  { %v3809_v42 = vpop.xlane.xlu0 %3808 }
0x1559   :  { %v3811_v43 = vmul.f32 0.03125, %v3809_v42  ;;  %v3806_v44 = vpop.xlane.xlu1 %3805 }
0x155a   :  { %v3810_v45 = vmul.f32 0.03125, %v3806_v44 }
0x155b   :  { %v3813_v46 = vadd.f32 1e-05, %v3811_v43 }
0x155c   :  { %v3812_v47 = vadd.f32 1e-05, %v3810_v45 }
0x155d   :  { %4636 = vrsqrt.f32 %v3813_v46 }
0x155e   :  { %4638 = vrsqrt.f32 %v3812_v47 }
0x1567   :  { %v4637_v49 = vpop.eup %4636 }
0x1568   :  { %v4639_v7 = vpop.eup %4638  ;;  %v3817_v50 = vmul.f32 %v4637_v49, %v3801_v35 }
0x1569   :  { %v3816_v51 = vmul.f32 %v4639_v7, %v3800_v32 }
0x156a   :  { %v3823_v59 = vmul.f32 %v3821_v48, %v3817_v50 }
0x156b   :  { %v3822_v52 = vmul.f32 %v3821_v48, %v3816_v51 }
0x156c   :  { %v3829_v54 = vadd.f32 %v3827_v58, %v3823_v59 }
0x156d   :  { %v3828_v53 = vadd.f32 %v3827_v58, %v3822_v52 }
0x156f   :  { %4450 = vmatprep.mubr.msk.f32.mxu0 %vm268_vm0, %v3828_v53 }
0x1570   :  { %4451 = vmatmul.mubr.msk.f32.vlgmr.msra.gmra.mrb[44].mxu0 %vm268_vm0, %v3829_v54 }
0x1643   :  { %v4452_v12 = vpop.f32.mrb[44].mxu0 }
0x1644   :  { %v3917_v56 = vadd.f32 %v4452_v12, %v4038_v55  ;;  %v3911_v57 = vpop.f32.mrb[45].mxu0 }
0x1645   :  { %v3912_v63 = vadd.f32 %v4038_v55, %v3911_v57 }
0x1646   :  { %3921 = vst.msk [vmem:[#allocation9 + $0x8] sm:$0xff] %vm161_vm10, %v3917_v56 }
0x1647   :  { %3920 = vst.msk [vmem:[#allocation9] sm:$0xff] %vm161_vm10, %v3912_v63 }
0x1648   :  { %4707 = shalt.err (!%p4704_p11)
}
0x1649   :  { %s4708_s14 = scalar_lea.hbm %s5383_s3, 256 }
0x164a   :  { %p4709_p12 = scmp.ne.s32.totalorder %s5383_s3, %s4708_s14  ;;  %p4712_p13 = scmp.lt.u32.totalorder %s4708_s14, %s5383_s3 }
0x164c   :  { %p4714_p0 = pnand %p4712_p13, %p4709_p12 }
0x164e   :  { %4717 = shalt.err (!%p4714_p0)
}
0x164f   :  { %3933 = dma.vmem_to_hbm [thread:$0]  %s3928_s11, 256, %s5383_s3, [#allocation4], %s4728_s26, %s4728_s26, %s4729_s27  }
0x1650   :  { %4724 = dma.done.wait [#allocation4], 256  }
0x1651   :  { %4725 = vsyncadd [#allocation4], 4294967040 }
0x1652   :  { %3937 = vsyncpa [#allocation3], 1 }
0x1653   :  { %3938 = vsyncpa [#allocation8], 1 }
0x1654   :  { %3939 = vsyncpa [#allocation4], 1 }
0x1655   :  { %3940 = vsyncpa [#allocation5], 1 }

</bundles_post_ra>
